<compile_context>
chip_gen: v5e
topology: v5e:2x2
jax: 0.10.0
libtpu: 0.0.40
codegen_flags: <defaults>
</compile_context>

<pallas_src>
import math
import functools

import jax
import jax.numpy as jnp
from jax import lax
from jax.experimental import pallas as pl
from jax.experimental.pallas import tpu as pltpu

_EPS = 1e-7
_SUB = 8      # sublanes processed per inner anchor sub-tile (1 f32 vreg / field)
_LANE = 128   # lanes per anchor row


def _round_up(a, m):
    return ((a + m - 1) // m) * m


def _obb_loss_kernel(tgt_ref, pred_ref, loss_ref, iou_ref, *,
                     num_targets, rows, sub, use_ciou, scale):
    # tgt_ref : SMEM [B, 7, X]        (tx, ty, A2, B2, C2, 0.5*log4+0.25*log(det2), atan(w/h))
    # pred_ref: VMEM (7, rows, 128)   (px, py, A1, B1, C1, 0.25*log(det1),          atan(w/h))
    # loss_ref: VMEM (rows, 128)
    # iou_ref : VMEM (X, rows, 128)
    b = pl.program_id(0)
    n_sub = rows // sub

    @pl.loop(0, n_sub)
    def _(r):
        base = pl.multiple_of(r * sub, sub)
        asl = pl.ds(base, sub)

        # Hoist the 7 pred-field loads above the target loop (1 vreg each).
        px = pred_ref[0, asl, :]
        py = pred_ref[1, asl, :]
        A1 = pred_ref[2, asl, :]
        B1 = pred_ref[3, asl, :]
        C1 = pred_ref[4, asl, :]
        hls1 = pred_ref[5, asl, :]        # 0.25 * log(det1)
        p_atan = pred_ref[6, asl, :]

        def tgt_step(x, iou_sum):
            # Scalar reads from SMEM, broadcast against the (sub, 128) tiles.
            tx = tgt_ref[b, 0, x]
            ty = tgt_ref[b, 1, x]
            A2 = tgt_ref[b, 2, x]
            B2 = tgt_ref[b, 3, x]
            C2 = tgt_ref[b, 4, x]
            hl4s2 = tgt_ref[b, 5, x]      # 0.5*log(4) + 0.25*log(det2)
            t_atan = tgt_ref[b, 6, x]

            sA = A1 + A2
            sB = B1 + B2
            sC = C1 + C2
            denom_core = sA * sB - sC * sC
            inv_denom = pl.reciprocal(denom_core + _EPS, approx=True)  # EUP slot

            dx = px - tx
            dy = py - ty
            t1 = (sA * dy * dy + sB * dx * dx) * (0.25 * inv_denom)
            t2 = (sC * (-dx) * dy) * (0.5 * inv_denom)
            # hoisted-log form of 0.5*log(denom / (4*sqrt(det1*det2)+eps) + eps)
            t3 = 0.5 * jnp.log(denom_core + _EPS) - hls1 - hl4s2

            bd = jnp.clip(t1 + t2 + t3, _EPS, 100.0)
            hd = jnp.sqrt(1.0 - jnp.exp(-bd) + _EPS)
            iou = 1.0 - hd

            if use_ciou:
                dv = t_atan - p_atan
                v = (4.0 / (math.pi ** 2)) * (dv * dv)
                alpha = v * pl.reciprocal(v + (1.0 - iou) + _EPS, approx=True)
                iou = iou - v * alpha

            iou_ref[x, asl, :] = iou
            return iou_sum + iou

        iou_sum = lax.fori_loop(0, num_targets, tgt_step,
                                jnp.zeros((sub, _LANE), jnp.float32),
                                unroll=num_targets <= 8)
        # loss = sum_x (1 - iou_x) * w / (w*X) == (X - sum_iou) * scale
        loss_ref[asl, :] = (float(num_targets) - iou_sum) * scale


def _cov_terms(w, h, theta):
    a = w * w * (1.0 / 12.0)
    b = h * h * (1.0 / 12.0)
    c, s = jnp.cos(theta), jnp.sin(theta)
    A = a * c * c + b * s * s
    B = a * s * s + b * c * c
    C = (a - b) * c * s
    det = jnp.maximum(A * B - C * C, 0.0)
    return A, B, C, det


def obb_loss(pred_bboxes, target_bboxes, target_scores=1, iou_type='CIoU'):
    """pred_bboxes: [B, N, 5], target_bboxes: [B, X, 5] (x, y, w, h, theta).
    Returns (loss [B, N], ious [B, N, X]) — same contract as OBBLoss.forward."""
    pred_bboxes = pred_bboxes.astype(jnp.float32)
    target_bboxes = target_bboxes.astype(jnp.float32)
    B, N, _ = pred_bboxes.shape
    X = target_bboxes.shape[-2]

    # TODO(synk): only the scalar / None target_scores branch of
    # check_target_scores is implemented (tensor branches involve host-side
    # prints and shape dispatch).
    if target_scores is None:
        target_scores = 1.0
    if not isinstance(target_scores, (int, float)):
        raise NotImplementedError("only scalar target_scores is supported")
    weight_val = float(target_scores)
    weight_sum = weight_val * X
    scale = weight_val / weight_sum          # == 1 / X

    # ---- anchor block sizing (VMEM-capped by X; keeps padding small) -------
    vmem_budget = 2 * 1024 * 1024            # per-buffer budget for the iou block
    rows_cap = max(_SUB, (vmem_budget // (max(X, 1) * _LANE * 4)) // _SUB * _SUB)
    rows_pref = min(128, rows_cap)
    nr_needed = pl.cdiv(N, _LANE)
    rows = max(_SUB, min(rows_pref, _round_up(nr_needed, _SUB)))
    nr = _round_up(nr_needed, rows)          # total rows of 128 anchors
    n_pad = nr * _LANE
    nt = nr // rows                          # anchor tiles (grid axis 1)

    # ---- pred-side precompute (O(B*N), done once in XLA) --------------------
    px, py, pw, ph, pt = (pred_bboxes[..., i] for i in range(5))
    A1, B1, C1, det1 = _cov_terms(pw, ph, pt)
    hls1 = 0.25 * jnp.log(det1 + 1e-30)      # 0.5*log(sqrt(det1))
    p_atan = jnp.arctan(pw / ph)             # arctan kept in XLA wrapper
    pred_packed = jnp.stack([px, py, A1, B1, C1, hls1, p_atan], axis=1)  # [B,7,N]
    if n_pad != N:
        # Benign padding values (no NaN/Inf downstream); padded lanes sliced off.
        pad_vals = jnp.array([0.0, 0.0, 1.0, 1.0, 0.0, 0.0, 0.0], jnp.float32)
        pad_blk = jnp.broadcast_to(pad_vals[None, :, None], (B, 7, n_pad - N))
        pred_packed = jnp.concatenate([pred_packed, pad_blk], axis=-1)
    pred_packed = pred_packed.reshape(B, 7, nr, _LANE)

    # ---- target-side precompute (tiny, lives in SMEM) ------------------------
    tx, ty, tw, th, tt = (target_bboxes[..., i] for i in range(5))
    A2, B2, C2, det2 = _cov_terms(tw, th, tt)
    hl4s2 = 0.5 * math.log(4.0) + 0.25 * jnp.log(det2 + 1e-30)  # 0.5*log(4*sqrt(det2))
    t_atan = jnp.arctan(tw / th)
    tgt_params = jnp.stack([tx, ty, A2, B2, C2, hl4s2, t_atan], axis=1)   # [B,7,X]

    kernel = functools.partial(_obb_loss_kernel,
                               num_targets=X, rows=rows, sub=_SUB,
                               use_ciou=(iou_type == 'CIoU'), scale=scale)

    loss3, iou4 = pl.pallas_call(
        kernel,
        out_shape=(jax.ShapeDtypeStruct((B, nr, _LANE), jnp.float32),
                   jax.ShapeDtypeStruct((B, X, nr, _LANE), jnp.float32)),
        grid=(B, nt),
        in_specs=[pl.BlockSpec(memory_space=pltpu.MemorySpace.SMEM),
                  pl.BlockSpec((None, 7, rows, _LANE), lambda b, n: (b, 0, n, 0))],
        out_specs=(pl.BlockSpec((None, rows, _LANE), lambda b, n: (b, n, 0)),
                   pl.BlockSpec((None, X, rows, _LANE), lambda b, n: (b, 0, n, 0))),
        compiler_params=pltpu.CompilerParams(
            dimension_semantics=("parallel", "parallel"),
            vmem_limit_bytes=32 * 1024 * 1024),
    )(tgt_params, pred_packed)

    loss = loss3.reshape(B, n_pad)[:, :N]                       # [B, N]
    ious = iou4.reshape(B, X, n_pad)[:, :, :N]                  # [B, X, N]
    # Small XLA transpose to meet the module contract; X stays off the lane dim.
    ious = jnp.transpose(ious, (0, 2, 1))                       # [B, N, X]
    return loss, ious


# ----------------------- pure-JAX reference (for checking) -----------------------
def _ref_obb_loss(pred, tgt, score, use_ciou):
    eps = 1e-7
    p = pred[:, :, None, :]   # [B, N, 1, 5]
    g = tgt[:, None, :, :]    # [B, 1, X, 5]

    def cov(w, h, t):
        a = w * w / 12.0
        b = h * h / 12.0
        c, s = jnp.cos(t), jnp.sin(t)
        return a * c * c + b * s * s, a * s * s + b * c * c, (a - b) * c * s

    A1, B1, C1 = cov(p[..., 2], p[..., 3], p[..., 4])
    A2, B2, C2 = cov(g[..., 2], g[..., 3], g[..., 4])
    dx = p[..., 0] - g[..., 0]
    dy = p[..., 1] - g[..., 1]
    sA, sB, sC = A1 + A2, B1 + B2, C1 + C2
    denom = sA * sB - sC * sC + eps
    t1 = (sA * dy * dy + sB * dx * dx) / denom * 0.25
    t2 = (sC * (-dx) * dy) / denom * 0.5
    det1 = jnp.maximum(A1 * B1 - C1 * C1, 0.0)
    det2 = jnp.maximum(A2 * B2 - C2 * C2, 0.0)
    t3 = 0.5 * jnp.log((sA * sB - sC * sC) / (4.0 * jnp.sqrt(det1 * det2) + eps) + eps)
    bd = jnp.clip(t1 + t2 + t3, eps, 100.0)
    iou = 1.0 - jnp.sqrt(1.0 - jnp.exp(-bd) + eps)
    if use_ciou:
        v = (4.0 / math.pi ** 2) * (jnp.arctan(g[..., 2] / g[..., 3]) -
                                    jnp.arctan(p[..., 2] / p[..., 3])) ** 2
        alpha = v / (v + (1.0 - iou) + eps)
        iou = iou - v * alpha
    X = tgt.shape[1]
    loss = ((1.0 - iou) * score).sum(-1) / (score * X)
    return loss, iou


if __name__ == "__main__":
    B, N, X = 2, 1100, 5   # N deliberately not a multiple of 128 -> exercises padding
    key = jax.random.PRNGKey(0)
    kp, kt = jax.random.split(key)

    def make_boxes(k, n):
        kxy, kwh, ka = jax.random.split(k, 3)
        xy = jax.random.uniform(kxy, (B, n, 2), minval=2.0, maxval=14.0)
        wh = jax.random.uniform(kwh, (B, n, 2), minval=2.0, maxval=8.0)
        th = jax.random.uniform(ka, (B, n, 1), minval=-math.pi / 2, maxval=math.pi / 2)
        return jnp.concatenate([xy, wh, th], axis=-1).astype(jnp.float32)

    pred = make_boxes(kp, N)      # [B, N, 5]
    target = make_boxes(kt, X)    # [B, X, 5]

    ok = True
    for iou_type, use_ciou in (('CIoU', True), ('IoU', False)):
        loss, ious = obb_loss(pred, target, target_scores=1, iou_type=iou_type)
        loss, ious = jax.block_until_ready((loss, ious))
        loss_ref, ious_ref = _ref_obb_loss(pred, target, 1.0, use_ciou)
        assert loss.shape == (B, N) and ious.shape == (B, N, X)
        # Tolerance deliberately loosened: kernel uses EUP approx reciprocals and
        # hoisted log(det) terms (few-1e-4 .. 1e-3 deviation vs exact reference).
        ok &= bool(jnp.allclose(loss, loss_ref, rtol=2e-2, atol=1e-2))
        ok &= bool(jnp.allclose(ious, ious_ref, rtol=2e-2, atol=1e-2))

    assert ok
    print("KERNEL_OK")
</pallas_src>

<mosaic_0001>
module attributes {stable_mosaic.version = 11 : i64} {
  func.func @_obb_loss_kernel(%arg0: i32, %arg1: i32, %arg2: memref<2x7x5xf32, #tpu.memory_space<smem>>, %arg3: memref<1x7x16x128xf32, #tpu.memory_space<vmem>>, %arg4: memref<1x16x128xf32, #tpu.memory_space<vmem>>, %arg5: memref<1x5x16x128xf32, #tpu.memory_space<vmem>>) attributes {dimension_semantics = [#tpu.dimension_semantics<parallel>, #tpu.dimension_semantics<parallel>], iteration_bounds = array<i64: 2, 1>, scalar_prefetch = 0 : i64, scratch_operands = 0 : i64, tpu.core_type = #tpu.core_type<tc>, window_params = [{transform_indices = @transform_0, window_bounds = array<i64: 2, 7, 5>}, {transform_indices = @transform_1, window_bounds = array<i64: 1, 7, 16, 128>}, {transform_indices = @transform_2, window_bounds = array<i64: 1, 16, 128>}, {transform_indices = @transform_3, window_bounds = array<i64: 1, 5, 16, 128>}]} {
    %c0_i32 = arith.constant 0 : i32
    %c2_i32 = arith.constant 2 : i32
    %0 = arith.addi %c0_i32, %c2_i32 : i32
    %c1_i32 = arith.constant 1 : i32
    scf.for %arg6 = %c0_i32 to %0 step %c1_i32  : i32 {
      %c1_i32_1 = arith.constant 1 : i32
      %1 = arith.muli %arg6, %c1_i32_1 : i32
      %c0_i32_2 = arith.constant 0 : i32
      %2 = arith.addi %c0_i32_2, %1 : i32
      %c8_i32 = arith.constant 8 : i32
      %3 = arith.muli %2, %c8_i32 : i32
      %4 = tpu.assume_multiple %3, 8 : i32
      %c0 = arith.constant 0 : index
      %c0_3 = arith.constant 0 : index
      %5 = arith.index_cast %4 : i32 to index
      %c0_4 = arith.constant 0 : index
      %6 = vector.load %arg3[%c0, %c0_3, %5, %c0_4] : memref<1x7x16x128xf32, #tpu.memory_space<vmem>>, vector<1x1x8x128xf32>
      %7 = vector.shape_cast %6 : vector<1x1x8x128xf32> to vector<8x128xf32>
      %c0_5 = arith.constant 0 : index
      %c1 = arith.constant 1 : index
      %8 = arith.index_cast %4 : i32 to index
      %c0_6 = arith.constant 0 : index
      %9 = vector.load %arg3[%c0_5, %c1, %8, %c0_6] : memref<1x7x16x128xf32, #tpu.memory_space<vmem>>, vector<1x1x8x128xf32>
      %10 = vector.shape_cast %9 : vector<1x1x8x128xf32> to vector<8x128xf32>
      %c0_7 = arith.constant 0 : index
      %c2 = arith.constant 2 : index
      %11 = arith.index_cast %4 : i32 to index
      %c0_8 = arith.constant 0 : index
      %12 = vector.load %arg3[%c0_7, %c2, %11, %c0_8] : memref<1x7x16x128xf32, #tpu.memory_space<vmem>>, vector<1x1x8x128xf32>
      %13 = vector.shape_cast %12 : vector<1x1x8x128xf32> to vector<8x128xf32>
      %c0_9 = arith.constant 0 : index
      %c3 = arith.constant 3 : index
      %14 = arith.index_cast %4 : i32 to index
      %c0_10 = arith.constant 0 : index
      %15 = vector.load %arg3[%c0_9, %c3, %14, %c0_10] : memref<1x7x16x128xf32, #tpu.memory_space<vmem>>, vector<1x1x8x128xf32>
      %16 = vector.shape_cast %15 : vector<1x1x8x128xf32> to vector<8x128xf32>
      %c0_11 = arith.constant 0 : index
      %c4 = arith.constant 4 : index
      %17 = arith.index_cast %4 : i32 to index
      %c0_12 = arith.constant 0 : index
      %18 = vector.load %arg3[%c0_11, %c4, %17, %c0_12] : memref<1x7x16x128xf32, #tpu.memory_space<vmem>>, vector<1x1x8x128xf32>
      %19 = vector.shape_cast %18 : vector<1x1x8x128xf32> to vector<8x128xf32>
      %c0_13 = arith.constant 0 : index
      %c5 = arith.constant 5 : index
      %20 = arith.index_cast %4 : i32 to index
      %c0_14 = arith.constant 0 : index
      %21 = vector.load %arg3[%c0_13, %c5, %20, %c0_14] : memref<1x7x16x128xf32, #tpu.memory_space<vmem>>, vector<1x1x8x128xf32>
      %22 = vector.shape_cast %21 : vector<1x1x8x128xf32> to vector<8x128xf32>
      %c0_15 = arith.constant 0 : index
      %c6 = arith.constant 6 : index
      %23 = arith.index_cast %4 : i32 to index
      %c0_16 = arith.constant 0 : index
      %24 = vector.load %arg3[%c0_15, %c6, %23, %c0_16] : memref<1x7x16x128xf32, #tpu.memory_space<vmem>>, vector<1x1x8x128xf32>
      %25 = vector.shape_cast %24 : vector<1x1x8x128xf32> to vector<8x128xf32>
      %cst = arith.constant 0.000000e+00 : f32
      %26 = vector.broadcast %cst : f32 to vector<8x128xf32>
      %c0_i32_17 = arith.constant 0 : i32
      %27 = arith.index_cast %arg0 : i32 to index
      %c0_18 = arith.constant 0 : index
      %28 = arith.index_cast %c0_i32_17 : i32 to index
      %29 = memref.load %arg2[%27, %c0_18, %28] : memref<2x7x5xf32, #tpu.memory_space<smem>>
      %30 = arith.index_cast %arg0 : i32 to index
      %c1_19 = arith.constant 1 : index
      %31 = arith.index_cast %c0_i32_17 : i32 to index
      %32 = memref.load %arg2[%30, %c1_19, %31] : memref<2x7x5xf32, #tpu.memory_space<smem>>
      %33 = arith.index_cast %arg0 : i32 to index
      %c2_20 = arith.constant 2 : index
      %34 = arith.index_cast %c0_i32_17 : i32 to index
      %35 = memref.load %arg2[%33, %c2_20, %34] : memref<2x7x5xf32, #tpu.memory_space<smem>>
      %36 = arith.index_cast %arg0 : i32 to index
      %c3_21 = arith.constant 3 : index
      %37 = arith.index_cast %c0_i32_17 : i32 to index
      %38 = memref.load %arg2[%36, %c3_21, %37] : memref<2x7x5xf32, #tpu.memory_space<smem>>
      %39 = arith.index_cast %arg0 : i32 to index
      %c4_22 = arith.constant 4 : index
      %40 = arith.index_cast %c0_i32_17 : i32 to index
      %41 = memref.load %arg2[%39, %c4_22, %40] : memref<2x7x5xf32, #tpu.memory_space<smem>>
      %42 = arith.index_cast %arg0 : i32 to index
      %c5_23 = arith.constant 5 : index
      %43 = arith.index_cast %c0_i32_17 : i32 to index
      %44 = memref.load %arg2[%42, %c5_23, %43] : memref<2x7x5xf32, #tpu.memory_space<smem>>
      %45 = arith.index_cast %arg0 : i32 to index
      %c6_24 = arith.constant 6 : index
      %46 = arith.index_cast %c0_i32_17 : i32 to index
      %47 = memref.load %arg2[%45, %c6_24, %46] : memref<2x7x5xf32, #tpu.memory_space<smem>>
      %48 = vector.broadcast %35 : f32 to vector<8x128xf32>
      %49 = arith.addf %13, %48 : vector<8x128xf32>
      %50 = vector.broadcast %38 : f32 to vector<8x128xf32>
      %51 = arith.addf %16, %50 : vector<8x128xf32>
      %52 = vector.broadcast %41 : f32 to vector<8x128xf32>
      %53 = arith.addf %19, %52 : vector<8x128xf32>
      %54 = arith.mulf %49, %51 : vector<8x128xf32>
      %55 = arith.mulf %53, %53 : vector<8x128xf32>
      %56 = arith.subf %54, %55 : vector<8x128xf32>
      %cst_25 = arith.constant 1.000000e-07 : f32
      %57 = vector.broadcast %cst_25 : f32 to vector<8x128xf32>
      %58 = arith.addf %56, %57 : vector<8x128xf32>
      %59 = tpu.reciprocal %58 {approx = true} : vector<8x128xf32> -> vector<8x128xf32>
      %60 = vector.broadcast %29 : f32 to vector<8x128xf32>
      %61 = arith.subf %7, %60 : vector<8x128xf32>
      %62 = vector.broadcast %32 : f32 to vector<8x128xf32>
      %63 = arith.subf %10, %62 : vector<8x128xf32>
      %64 = arith.mulf %49, %63 : vector<8x128xf32>
      %65 = arith.mulf %64, %63 : vector<8x128xf32>
      %66 = arith.mulf %51, %61 : vector<8x128xf32>
      %67 = arith.mulf %66, %61 : vector<8x128xf32>
      %68 = arith.addf %65, %67 : vector<8x128xf32>
      %cst_26 = arith.constant 2.500000e-01 : f32
      %69 = vector.broadcast %cst_26 : f32 to vector<8x128xf32>
      %70 = arith.mulf %69, %59 : vector<8x128xf32>
      %71 = arith.mulf %68, %70 : vector<8x128xf32>
      %cst_27 = arith.constant 0.000000e+00 : f32
      %72 = vector.broadcast %cst_27 : f32 to vector<8x128xf32>
      %73 = arith.subf %72, %61 : vector<8x128xf32>
      %74 = arith.mulf %53, %73 : vector<8x128xf32>
      %75 = arith.mulf %74, %63 : vector<8x128xf32>
      %cst_28 = arith.constant 5.000000e-01 : f32
      %76 = vector.broadcast %cst_28 : f32 to vector<8x128xf32>
      %77 = arith.mulf %76, %59 : vector<8x128xf32>
      %78 = arith.mulf %75, %77 : vector<8x128xf32>
      %cst_29 = arith.constant 1.000000e-07 : f32
      %79 = vector.broadcast %cst_29 : f32 to vector<8x128xf32>
      %80 = arith.addf %56, %79 : vector<8x128xf32>
      %81 = math.log %80 : vector<8x128xf32>
      %cst_30 = arith.constant 5.000000e-01 : f32
      %82 = vector.broadcast %cst_30 : f32 to vector<8x128xf32>
      %83 = arith.mulf %82, %81 : vector<8x128xf32>
      %84 = arith.subf %83, %22 : vector<8x128xf32>
      %85 = vector.broadcast %44 : f32 to vector<8x128xf32>
      %86 = arith.subf %84, %85 : vector<8x128xf32>
      %87 = arith.addf %71, %78 : vector<8x128xf32>
      %88 = arith.addf %87, %86 : vector<8x128xf32>
      %cst_31 = arith.constant 1.000000e-07 : f32
      %cst_32 = arith.constant 1.000000e+02 : f32
      %89 = vector.broadcast %cst_31 : f32 to vector<8x128xf32>
      %90 = arith.maximumf %89, %88 : vector<8x128xf32>
      %91 = vector.broadcast %cst_32 : f32 to vector<8x128xf32>
      %92 = arith.minimumf %91, %90 : vector<8x128xf32>
      %cst_33 = arith.constant 0.000000e+00 : f32
      %93 = vector.broadcast %cst_33 : f32 to vector<8x128xf32>
      %94 = arith.subf %93, %92 : vector<8x128xf32>
      %95 = math.exp %94 : vector<8x128xf32>
      %cst_34 = arith.constant 1.000000e+00 : f32
      %96 = vector.broadcast %cst_34 : f32 to vector<8x128xf32>
      %97 = arith.subf %96, %95 : vector<8x128xf32>
      %cst_35 = arith.constant 1.000000e-07 : f32
      %98 = vector.broadcast %cst_35 : f32 to vector<8x128xf32>
      %99 = arith.addf %97, %98 : vector<8x128xf32>
      %100 = math.sqrt %99 : vector<8x128xf32>
      %cst_36 = arith.constant 1.000000e+00 : f32
      %101 = vector.broadcast %cst_36 : f32 to vector<8x128xf32>
      %102 = arith.subf %101, %100 : vector<8x128xf32>
      %103 = vector.broadcast %47 : f32 to vector<8x128xf32>
      %104 = arith.subf %103, %25 : vector<8x128xf32>
      %105 = arith.mulf %104, %104 : vector<8x128xf32>
      %cst_37 = arith.constant 0.405284733 : f32
      %106 = vector.broadcast %cst_37 : f32 to vector<8x128xf32>
      %107 = arith.mulf %106, %105 : vector<8x128xf32>
      %cst_38 = arith.constant 1.000000e+00 : f32
      %108 = vector.broadcast %cst_38 : f32 to vector<8x128xf32>
      %109 = arith.subf %108, %102 : vector<8x128xf32>
      %110 = arith.addf %107, %109 : vector<8x128xf32>
      %cst_39 = arith.constant 1.000000e-07 : f32
      %111 = vector.broadcast %cst_39 : f32 to vector<8x128xf32>
      %112 = arith.addf %110, %111 : vector<8x128xf32>
      %113 = tpu.reciprocal %112 {approx = true} : vector<8x128xf32> -> vector<8x128xf32>
      %114 = arith.mulf %107, %113 : vector<8x128xf32>
      %115 = arith.mulf %107, %114 : vector<8x128xf32>
      %116 = arith.subf %102, %115 : vector<8x128xf32>
      %c0_40 = arith.constant 0 : index
      %117 = arith.index_cast %c0_i32_17 : i32 to index
      %118 = arith.index_cast %4 : i32 to index
      %c0_41 = arith.constant 0 : index
      %119 = vector.load %arg5[%c0_40, %117, %118, %c0_41] : memref<1x5x16x128xf32, #tpu.memory_space<vmem>>, vector<1x1x8x128xf32>
      %120 = vector.shape_cast %119 : vector<1x1x8x128xf32> to vector<8x128xf32>
      %121 = vector.shape_cast %116 : vector<8x128xf32> to vector<1x1x8x128xf32>
      tpu.vector_store %arg5[%c0_40, %117, %118, %c0_41], %121 {strides = array<i32>} : memref<1x5x16x128xf32, #tpu.memory_space<vmem>>, vector<1x1x8x128xf32>,
      %122 = arith.addf %26, %116 : vector<8x128xf32>
      %c1_i32_42 = arith.constant 1 : i32
      %123 = arith.index_cast %arg0 : i32 to index
      %c0_43 = arith.constant 0 : index
      %124 = arith.index_cast %c1_i32_42 : i32 to index
      %125 = memref.load %arg2[%123, %c0_43, %124] : memref<2x7x5xf32, #tpu.memory_space<smem>>
      %126 = arith.index_cast %arg0 : i32 to index
      %c1_44 = arith.constant 1 : index
      %127 = arith.index_cast %c1_i32_42 : i32 to index
      %128 = memref.load %arg2[%126, %c1_44, %127] : memref<2x7x5xf32, #tpu.memory_space<smem>>
      %129 = arith.index_cast %arg0 : i32 to index
      %c2_45 = arith.constant 2 : index
      %130 = arith.index_cast %c1_i32_42 : i32 to index
      %131 = memref.load %arg2[%129, %c2_45, %130] : memref<2x7x5xf32, #tpu.memory_space<smem>>
      %132 = arith.index_cast %arg0 : i32 to index
      %c3_46 = arith.constant 3 : index
      %133 = arith.index_cast %c1_i32_42 : i32 to index
      %134 = memref.load %arg2[%132, %c3_46, %133] : memref<2x7x5xf32, #tpu.memory_space<smem>>
      %135 = arith.index_cast %arg0 : i32 to index
      %c4_47 = arith.constant 4 : index
      %136 = arith.index_cast %c1_i32_42 : i32 to index
      %137 = memref.load %arg2[%135, %c4_47, %136] : memref<2x7x5xf32, #tpu.memory_space<smem>>
      %138 = arith.index_cast %arg0 : i32 to index
      %c5_48 = arith.constant 5 : index
      %139 = arith.index_cast %c1_i32_42 : i32 to index
      %140 = memref.load %arg2[%138, %c5_48, %139] : memref<2x7x5xf32, #tpu.memory_space<smem>>
      %141 = arith.index_cast %arg0 : i32 to index
      %c6_49 = arith.constant 6 : index
      %142 = arith.index_cast %c1_i32_42 : i32 to index
      %143 = memref.load %arg2[%141, %c6_49, %142] : memref<2x7x5xf32, #tpu.memory_space<smem>>
      %144 = vector.broadcast %131 : f32 to vector<8x128xf32>
      %145 = arith.addf %13, %144 : vector<8x128xf32>
      %146 = vector.broadcast %134 : f32 to vector<8x128xf32>
      %147 = arith.addf %16, %146 : vector<8x128xf32>
      %148 = vector.broadcast %137 : f32 to vector<8x128xf32>
      %149 = arith.addf %19, %148 : vector<8x128xf32>
      %150 = arith.mulf %145, %147 : vector<8x128xf32>
      %151 = arith.mulf %149, %149 : vector<8x128xf32>
      %152 = arith.subf %150, %151 : vector<8x128xf32>
      %cst_50 = arith.constant 1.000000e-07 : f32
      %153 = vector.broadcast %cst_50 : f32 to vector<8x128xf32>
      %154 = arith.addf %152, %153 : vector<8x128xf32>
      %155 = tpu.reciprocal %154 {approx = true} : vector<8x128xf32> -> vector<8x128xf32>
      %156 = vector.broadcast %125 : f32 to vector<8x128xf32>
      %157 = arith.subf %7, %156 : vector<8x128xf32>
      %158 = vector.broadcast %128 : f32 to vector<8x128xf32>
      %159 = arith.subf %10, %158 : vector<8x128xf32>
      %160 = arith.mulf %145, %159 : vector<8x128xf32>
      %161 = arith.mulf %160, %159 : vector<8x128xf32>
      %162 = arith.mulf %147, %157 : vector<8x128xf32>
      %163 = arith.mulf %162, %157 : vector<8x128xf32>
      %164 = arith.addf %161, %163 : vector<8x128xf32>
      %cst_51 = arith.constant 2.500000e-01 : f32
      %165 = vector.broadcast %cst_51 : f32 to vector<8x128xf32>
      %166 = arith.mulf %165, %155 : vector<8x128xf32>
      %167 = arith.mulf %164, %166 : vector<8x128xf32>
      %cst_52 = arith.constant 0.000000e+00 : f32
      %168 = vector.broadcast %cst_52 : f32 to vector<8x128xf32>
      %169 = arith.subf %168, %157 : vector<8x128xf32>
      %170 = arith.mulf %149, %169 : vector<8x128xf32>
      %171 = arith.mulf %170, %159 : vector<8x128xf32>
      %cst_53 = arith.constant 5.000000e-01 : f32
      %172 = vector.broadcast %cst_53 : f32 to vector<8x128xf32>
      %173 = arith.mulf %172, %155 : vector<8x128xf32>
      %174 = arith.mulf %171, %173 : vector<8x128xf32>
      %cst_54 = arith.constant 1.000000e-07 : f32
      %175 = vector.broadcast %cst_54 : f32 to vector<8x128xf32>
      %176 = arith.addf %152, %175 : vector<8x128xf32>
      %177 = math.log %176 : vector<8x128xf32>
      %cst_55 = arith.constant 5.000000e-01 : f32
      %178 = vector.broadcast %cst_55 : f32 to vector<8x128xf32>
      %179 = arith.mulf %178, %177 : vector<8x128xf32>
      %180 = arith.subf %179, %22 : vector<8x128xf32>
      %181 = vector.broadcast %140 : f32 to vector<8x128xf32>
      %182 = arith.subf %180, %181 : vector<8x128xf32>
      %183 = arith.addf %167, %174 : vector<8x128xf32>
      %184 = arith.addf %183, %182 : vector<8x128xf32>
      %cst_56 = arith.constant 1.000000e-07 : f32
      %cst_57 = arith.constant 1.000000e+02 : f32
      %185 = vector.broadcast %cst_56 : f32 to vector<8x128xf32>
      %186 = arith.maximumf %185, %184 : vector<8x128xf32>
      %187 = vector.broadcast %cst_57 : f32 to vector<8x128xf32>
      %188 = arith.minimumf %187, %186 : vector<8x128xf32>
      %cst_58 = arith.constant 0.000000e+00 : f32
      %189 = vector.broadcast %cst_58 : f32 to vector<8x128xf32>
      %190 = arith.subf %189, %188 : vector<8x128xf32>
      %191 = math.exp %190 : vector<8x128xf32>
      %cst_59 = arith.constant 1.000000e+00 : f32
      %192 = vector.broadcast %cst_59 : f32 to vector<8x128xf32>
      %193 = arith.subf %192, %191 : vector<8x128xf32>
      %cst_60 = arith.constant 1.000000e-07 : f32
      %194 = vector.broadcast %cst_60 : f32 to vector<8x128xf32>
      %195 = arith.addf %193, %194 : vector<8x128xf32>
      %196 = math.sqrt %195 : vector<8x128xf32>
      %cst_61 = arith.constant 1.000000e+00 : f32
      %197 = vector.broadcast %cst_61 : f32 to vector<8x128xf32>
      %198 = arith.subf %197, %196 : vector<8x128xf32>
      %199 = vector.broadcast %143 : f32 to vector<8x128xf32>
      %200 = arith.subf %199, %25 : vector<8x128xf32>
      %201 = arith.mulf %200, %200 : vector<8x128xf32>
      %cst_62 = arith.constant 0.405284733 : f32
      %202 = vector.broadcast %cst_62 : f32 to vector<8x128xf32>
      %203 = arith.mulf %202, %201 : vector<8x128xf32>
      %cst_63 = arith.constant 1.000000e+00 : f32
      %204 = vector.broadcast %cst_63 : f32 to vector<8x128xf32>
      %205 = arith.subf %204, %198 : vector<8x128xf32>
      %206 = arith.addf %203, %205 : vector<8x128xf32>
      %cst_64 = arith.constant 1.000000e-07 : f32
      %207 = vector.broadcast %cst_64 : f32 to vector<8x128xf32>
      %208 = arith.addf %206, %207 : vector<8x128xf32>
      %209 = tpu.reciprocal %208 {approx = true} : vector<8x128xf32> -> vector<8x128xf32>
      %210 = arith.mulf %203, %209 : vector<8x128xf32>
      %211 = arith.mulf %203, %210 : vector<8x128xf32>
      %212 = arith.subf %198, %211 : vector<8x128xf32>
      %c0_65 = arith.constant 0 : index
      %213 = arith.index_cast %c1_i32_42 : i32 to index
      %214 = arith.index_cast %4 : i32 to index
      %c0_66 = arith.constant 0 : index
      %215 = vector.load %arg5[%c0_65, %213, %214, %c0_66] : memref<1x5x16x128xf32, #tpu.memory_space<vmem>>, vector<1x1x8x128xf32>
      %216 = vector.shape_cast %215 : vector<1x1x8x128xf32> to vector<8x128xf32>
      %217 = vector.shape_cast %212 : vector<8x128xf32> to vector<1x1x8x128xf32>
      tpu.vector_store %arg5[%c0_65, %213, %214, %c0_66], %217 {strides = array<i32>} : memref<1x5x16x128xf32, #tpu.memory_space<vmem>>, vector<1x1x8x128xf32>,
      %218 = arith.addf %122, %212 : vector<8x128xf32>
      %c2_i32_67 = arith.constant 2 : i32
      %219 = arith.index_cast %arg0 : i32 to index
      %c0_68 = arith.constant 0 : index
      %220 = arith.index_cast %c2_i32_67 : i32 to index
      %221 = memref.load %arg2[%219, %c0_68, %220] : memref<2x7x5xf32, #tpu.memory_space<smem>>
      %222 = arith.index_cast %arg0 : i32 to index
      %c1_69 = arith.constant 1 : index
      %223 = arith.index_cast %c2_i32_67 : i32 to index
      %224 = memref.load %arg2[%222, %c1_69, %223] : memref<2x7x5xf32, #tpu.memory_space<smem>>
      %225 = arith.index_cast %arg0 : i32 to index
      %c2_70 = arith.constant 2 : index
      %226 = arith.index_cast %c2_i32_67 : i32 to index
      %227 = memref.load %arg2[%225, %c2_70, %226] : memref<2x7x5xf32, #tpu.memory_space<smem>>
      %228 = arith.index_cast %arg0 : i32 to index
      %c3_71 = arith.constant 3 : index
      %229 = arith.index_cast %c2_i32_67 : i32 to index
      %230 = memref.load %arg2[%228, %c3_71, %229] : memref<2x7x5xf32, #tpu.memory_space<smem>>
      %231 = arith.index_cast %arg0 : i32 to index
      %c4_72 = arith.constant 4 : index
      %232 = arith.index_cast %c2_i32_67 : i32 to index
      %233 = memref.load %arg2[%231, %c4_72, %232] : memref<2x7x5xf32, #tpu.memory_space<smem>>
      %234 = arith.index_cast %arg0 : i32 to index
      %c5_73 = arith.constant 5 : index
      %235 = arith.index_cast %c2_i32_67 : i32 to index
      %236 = memref.load %arg2[%234, %c5_73, %235] : memref<2x7x5xf32, #tpu.memory_space<smem>>
      %237 = arith.index_cast %arg0 : i32 to index
      %c6_74 = arith.constant 6 : index
      %238 = arith.index_cast %c2_i32_67 : i32 to index
      %239 = memref.load %arg2[%237, %c6_74, %238] : memref<2x7x5xf32, #tpu.memory_space<smem>>
      %240 = vector.broadcast %227 : f32 to vector<8x128xf32>
      %241 = arith.addf %13, %240 : vector<8x128xf32>
      %242 = vector.broadcast %230 : f32 to vector<8x128xf32>
      %243 = arith.addf %16, %242 : vector<8x128xf32>
      %244 = vector.broadcast %233 : f32 to vector<8x128xf32>
      %245 = arith.addf %19, %244 : vector<8x128xf32>
      %246 = arith.mulf %241, %243 : vector<8x128xf32>
      %247 = arith.mulf %245, %245 : vector<8x128xf32>
      %248 = arith.subf %246, %247 : vector<8x128xf32>
      %cst_75 = arith.constant 1.000000e-07 : f32
      %249 = vector.broadcast %cst_75 : f32 to vector<8x128xf32>
      %250 = arith.addf %248, %249 : vector<8x128xf32>
      %251 = tpu.reciprocal %250 {approx = true} : vector<8x128xf32> -> vector<8x128xf32>
      %252 = vector.broadcast %221 : f32 to vector<8x128xf32>
      %253 = arith.subf %7, %252 : vector<8x128xf32>
      %254 = vector.broadcast %224 : f32 to vector<8x128xf32>
      %255 = arith.subf %10, %254 : vector<8x128xf32>
      %256 = arith.mulf %241, %255 : vector<8x128xf32>
      %257 = arith.mulf %256, %255 : vector<8x128xf32>
      %258 = arith.mulf %243, %253 : vector<8x128xf32>
      %259 = arith.mulf %258, %253 : vector<8x128xf32>
      %260 = arith.addf %257, %259 : vector<8x128xf32>
      %cst_76 = arith.constant 2.500000e-01 : f32
      %261 = vector.broadcast %cst_76 : f32 to vector<8x128xf32>
      %262 = arith.mulf %261, %251 : vector<8x128xf32>
      %263 = arith.mulf %260, %262 : vector<8x128xf32>
      %cst_77 = arith.constant 0.000000e+00 : f32
      %264 = vector.broadcast %cst_77 : f32 to vector<8x128xf32>
      %265 = arith.subf %264, %253 : vector<8x128xf32>
      %266 = arith.mulf %245, %265 : vector<8x128xf32>
      %267 = arith.mulf %266, %255 : vector<8x128xf32>
      %cst_78 = arith.constant 5.000000e-01 : f32
      %268 = vector.broadcast %cst_78 : f32 to vector<8x128xf32>
      %269 = arith.mulf %268, %251 : vector<8x128xf32>
      %270 = arith.mulf %267, %269 : vector<8x128xf32>
      %cst_79 = arith.constant 1.000000e-07 : f32
      %271 = vector.broadcast %cst_79 : f32 to vector<8x128xf32>
      %272 = arith.addf %248, %271 : vector<8x128xf32>
      %273 = math.log %272 : vector<8x128xf32>
      %cst_80 = arith.constant 5.000000e-01 : f32
      %274 = vector.broadcast %cst_80 : f32 to vector<8x128xf32>
      %275 = arith.mulf %274, %273 : vector<8x128xf32>
      %276 = arith.subf %275, %22 : vector<8x128xf32>
      %277 = vector.broadcast %236 : f32 to vector<8x128xf32>
      %278 = arith.subf %276, %277 : vector<8x128xf32>
      %279 = arith.addf %263, %270 : vector<8x128xf32>
      %280 = arith.addf %279, %278 : vector<8x128xf32>
      %cst_81 = arith.constant 1.000000e-07 : f32
      %cst_82 = arith.constant 1.000000e+02 : f32
      %281 = vector.broadcast %cst_81 : f32 to vector<8x128xf32>
      %282 = arith.maximumf %281, %280 : vector<8x128xf32>
      %283 = vector.broadcast %cst_82 : f32 to vector<8x128xf32>
      %284 = arith.minimumf %283, %282 : vector<8x128xf32>
      %cst_83 = arith.constant 0.000000e+00 : f32
      %285 = vector.broadcast %cst_83 : f32 to vector<8x128xf32>
      %286 = arith.subf %285, %284 : vector<8x128xf32>
      %287 = math.exp %286 : vector<8x128xf32>
      %cst_84 = arith.constant 1.000000e+00 : f32
      %288 = vector.broadcast %cst_84 : f32 to vector<8x128xf32>
      %289 = arith.subf %288, %287 : vector<8x128xf32>
      %cst_85 = arith.constant 1.000000e-07 : f32
      %290 = vector.broadcast %cst_85 : f32 to vector<8x128xf32>
      %291 = arith.addf %289, %290 : vector<8x128xf32>
      %292 = math.sqrt %291 : vector<8x128xf32>
      %cst_86 = arith.constant 1.000000e+00 : f32
      %293 = vector.broadcast %cst_86 : f32 to vector<8x128xf32>
      %294 = arith.subf %293, %292 : vector<8x128xf32>
      %295 = vector.broadcast %239 : f32 to vector<8x128xf32>
      %296 = arith.subf %295, %25 : vector<8x128xf32>
      %297 = arith.mulf %296, %296 : vector<8x128xf32>
      %cst_87 = arith.constant 0.405284733 : f32
      %298 = vector.broadcast %cst_87 : f32 to vector<8x128xf32>
      %299 = arith.mulf %298, %297 : vector<8x128xf32>
      %cst_88 = arith.constant 1.000000e+00 : f32
      %300 = vector.broadcast %cst_88 : f32 to vector<8x128xf32>
      %301 = arith.subf %300, %294 : vector<8x128xf32>
      %302 = arith.addf %299, %301 : vector<8x128xf32>
      %cst_89 = arith.constant 1.000000e-07 : f32
      %303 = vector.broadcast %cst_89 : f32 to vector<8x128xf32>
      %304 = arith.addf %302, %303 : vector<8x128xf32>
      %305 = tpu.reciprocal %304 {approx = true} : vector<8x128xf32> -> vector<8x128xf32>
      %306 = arith.mulf %299, %305 : vector<8x128xf32>
      %307 = arith.mulf %299, %306 : vector<8x128xf32>
      %308 = arith.subf %294, %307 : vector<8x128xf32>
      %c0_90 = arith.constant 0 : index
      %309 = arith.index_cast %c2_i32_67 : i32 to index
      %310 = arith.index_cast %4 : i32 to index
      %c0_91 = arith.constant 0 : index
      %311 = vector.load %arg5[%c0_90, %309, %310, %c0_91] : memref<1x5x16x128xf32, #tpu.memory_space<vmem>>, vector<1x1x8x128xf32>
      %312 = vector.shape_cast %311 : vector<1x1x8x128xf32> to vector<8x128xf32>
      %313 = vector.shape_cast %308 : vector<8x128xf32> to vector<1x1x8x128xf32>
      tpu.vector_store %arg5[%c0_90, %309, %310, %c0_91], %313 {strides = array<i32>} : memref<1x5x16x128xf32, #tpu.memory_space<vmem>>, vector<1x1x8x128xf32>,
      %314 = arith.addf %218, %308 : vector<8x128xf32>
      %c3_i32 = arith.constant 3 : i32
      %315 = arith.index_cast %arg0 : i32 to index
      %c0_92 = arith.constant 0 : index
      %316 = arith.index_cast %c3_i32 : i32 to index
      %317 = memref.load %arg2[%315, %c0_92, %316] : memref<2x7x5xf32, #tpu.memory_space<smem>>
      %318 = arith.index_cast %arg0 : i32 to index
      %c1_93 = arith.constant 1 : index
      %319 = arith.index_cast %c3_i32 : i32 to index
      %320 = memref.load %arg2[%318, %c1_93, %319] : memref<2x7x5xf32, #tpu.memory_space<smem>>
      %321 = arith.index_cast %arg0 : i32 to index
      %c2_94 = arith.constant 2 : index
      %322 = arith.index_cast %c3_i32 : i32 to index
      %323 = memref.load %arg2[%321, %c2_94, %322] : memref<2x7x5xf32, #tpu.memory_space<smem>>
      %324 = arith.index_cast %arg0 : i32 to index
      %c3_95 = arith.constant 3 : index
      %325 = arith.index_cast %c3_i32 : i32 to index
      %326 = memref.load %arg2[%324, %c3_95, %325] : memref<2x7x5xf32, #tpu.memory_space<smem>>
      %327 = arith.index_cast %arg0 : i32 to index
      %c4_96 = arith.constant 4 : index
      %328 = arith.index_cast %c3_i32 : i32 to index
      %329 = memref.load %arg2[%327, %c4_96, %328] : memref<2x7x5xf32, #tpu.memory_space<smem>>
      %330 = arith.index_cast %arg0 : i32 to index
      %c5_97 = arith.constant 5 : index
      %331 = arith.index_cast %c3_i32 : i32 to index
      %332 = memref.load %arg2[%330, %c5_97, %331] : memref<2x7x5xf32, #tpu.memory_space<smem>>
      %333 = arith.index_cast %arg0 : i32 to index
      %c6_98 = arith.constant 6 : index
      %334 = arith.index_cast %c3_i32 : i32 to index
      %335 = memref.load %arg2[%333, %c6_98, %334] : memref<2x7x5xf32, #tpu.memory_space<smem>>
      %336 = vector.broadcast %323 : f32 to vector<8x128xf32>
      %337 = arith.addf %13, %336 : vector<8x128xf32>
      %338 = vector.broadcast %326 : f32 to vector<8x128xf32>
      %339 = arith.addf %16, %338 : vector<8x128xf32>
      %340 = vector.broadcast %329 : f32 to vector<8x128xf32>
      %341 = arith.addf %19, %340 : vector<8x128xf32>
      %342 = arith.mulf %337, %339 : vector<8x128xf32>
      %343 = arith.mulf %341, %341 : vector<8x128xf32>
      %344 = arith.subf %342, %343 : vector<8x128xf32>
      %cst_99 = arith.constant 1.000000e-07 : f32
      %345 = vector.broadcast %cst_99 : f32 to vector<8x128xf32>
      %346 = arith.addf %344, %345 : vector<8x128xf32>
      %347 = tpu.reciprocal %346 {approx = true} : vector<8x128xf32> -> vector<8x128xf32>
      %348 = vector.broadcast %317 : f32 to vector<8x128xf32>
      %349 = arith.subf %7, %348 : vector<8x128xf32>
      %350 = vector.broadcast %320 : f32 to vector<8x128xf32>
      %351 = arith.subf %10, %350 : vector<8x128xf32>
      %352 = arith.mulf %337, %351 : vector<8x128xf32>
      %353 = arith.mulf %352, %351 : vector<8x128xf32>
      %354 = arith.mulf %339, %349 : vector<8x128xf32>
      %355 = arith.mulf %354, %349 : vector<8x128xf32>
      %356 = arith.addf %353, %355 : vector<8x128xf32>
      %cst_100 = arith.constant 2.500000e-01 : f32
      %357 = vector.broadcast %cst_100 : f32 to vector<8x128xf32>
      %358 = arith.mulf %357, %347 : vector<8x128xf32>
      %359 = arith.mulf %356, %358 : vector<8x128xf32>
      %cst_101 = arith.constant 0.000000e+00 : f32
      %360 = vector.broadcast %cst_101 : f32 to vector<8x128xf32>
      %361 = arith.subf %360, %349 : vector<8x128xf32>
      %362 = arith.mulf %341, %361 : vector<8x128xf32>
      %363 = arith.mulf %362, %351 : vector<8x128xf32>
      %cst_102 = arith.constant 5.000000e-01 : f32
      %364 = vector.broadcast %cst_102 : f32 to vector<8x128xf32>
      %365 = arith.mulf %364, %347 : vector<8x128xf32>
      %366 = arith.mulf %363, %365 : vector<8x128xf32>
      %cst_103 = arith.constant 1.000000e-07 : f32
      %367 = vector.broadcast %cst_103 : f32 to vector<8x128xf32>
      %368 = arith.addf %344, %367 : vector<8x128xf32>
      %369 = math.log %368 : vector<8x128xf32>
      %cst_104 = arith.constant 5.000000e-01 : f32
      %370 = vector.broadcast %cst_104 : f32 to vector<8x128xf32>
      %371 = arith.mulf %370, %369 : vector<8x128xf32>
      %372 = arith.subf %371, %22 : vector<8x128xf32>
      %373 = vector.broadcast %332 : f32 to vector<8x128xf32>
      %374 = arith.subf %372, %373 : vector<8x128xf32>
      %375 = arith.addf %359, %366 : vector<8x128xf32>
      %376 = arith.addf %375, %374 : vector<8x128xf32>
      %cst_105 = arith.constant 1.000000e-07 : f32
      %cst_106 = arith.constant 1.000000e+02 : f32
      %377 = vector.broadcast %cst_105 : f32 to vector<8x128xf32>
      %378 = arith.maximumf %377, %376 : vector<8x128xf32>
      %379 = vector.broadcast %cst_106 : f32 to vector<8x128xf32>
      %380 = arith.minimumf %379, %378 : vector<8x128xf32>
      %cst_107 = arith.constant 0.000000e+00 : f32
      %381 = vector.broadcast %cst_107 : f32 to vector<8x128xf32>
      %382 = arith.subf %381, %380 : vector<8x128xf32>
      %383 = math.exp %382 : vector<8x128xf32>
      %cst_108 = arith.constant 1.000000e+00 : f32
      %384 = vector.broadcast %cst_108 : f32 to vector<8x128xf32>
      %385 = arith.subf %384, %383 : vector<8x128xf32>
      %cst_109 = arith.constant 1.000000e-07 : f32
      %386 = vector.broadcast %cst_109 : f32 to vector<8x128xf32>
      %387 = arith.addf %385, %386 : vector<8x128xf32>
      %388 = math.sqrt %387 : vector<8x128xf32>
      %cst_110 = arith.constant 1.000000e+00 : f32
      %389 = vector.broadcast %cst_110 : f32 to vector<8x128xf32>
      %390 = arith.subf %389, %388 : vector<8x128xf32>
      %391 = vector.broadcast %335 : f32 to vector<8x128xf32>
      %392 = arith.subf %391, %25 : vector<8x128xf32>
      %393 = arith.mulf %392, %392 : vector<8x128xf32>
      %cst_111 = arith.constant 0.405284733 : f32
      %394 = vector.broadcast %cst_111 : f32 to vector<8x128xf32>
      %395 = arith.mulf %394, %393 : vector<8x128xf32>
      %cst_112 = arith.constant 1.000000e+00 : f32
      %396 = vector.broadcast %cst_112 : f32 to vector<8x128xf32>
      %397 = arith.subf %396, %390 : vector<8x128xf32>
      %398 = arith.addf %395, %397 : vector<8x128xf32>
      %cst_113 = arith.constant 1.000000e-07 : f32
      %399 = vector.broadcast %cst_113 : f32 to vector<8x128xf32>
      %400 = arith.addf %398, %399 : vector<8x128xf32>
      %401 = tpu.reciprocal %400 {approx = true} : vector<8x128xf32> -> vector<8x128xf32>
      %402 = arith.mulf %395, %401 : vector<8x128xf32>
      %403 = arith.mulf %395, %402 : vector<8x128xf32>
      %404 = arith.subf %390, %403 : vector<8x128xf32>
      %c0_114 = arith.constant 0 : index
      %405 = arith.index_cast %c3_i32 : i32 to index
      %406 = arith.index_cast %4 : i32 to index
      %c0_115 = arith.constant 0 : index
      %407 = vector.load %arg5[%c0_114, %405, %406, %c0_115] : memref<1x5x16x128xf32, #tpu.memory_space<vmem>>, vector<1x1x8x128xf32>
      %408 = vector.shape_cast %407 : vector<1x1x8x128xf32> to vector<8x128xf32>
      %409 = vector.shape_cast %404 : vector<8x128xf32> to vector<1x1x8x128xf32>
      tpu.vector_store %arg5[%c0_114, %405, %406, %c0_115], %409 {strides = array<i32>} : memref<1x5x16x128xf32, #tpu.memory_space<vmem>>, vector<1x1x8x128xf32>,
      %410 = arith.addf %314, %404 : vector<8x128xf32>
      %c4_i32 = arith.constant 4 : i32
      %411 = arith.index_cast %arg0 : i32 to index
      %c0_116 = arith.constant 0 : index
      %412 = arith.index_cast %c4_i32 : i32 to index
      %413 = memref.load %arg2[%411, %c0_116, %412] : memref<2x7x5xf32, #tpu.memory_space<smem>>
      %414 = arith.index_cast %arg0 : i32 to index
      %c1_117 = arith.constant 1 : index
      %415 = arith.index_cast %c4_i32 : i32 to index
      %416 = memref.load %arg2[%414, %c1_117, %415] : memref<2x7x5xf32, #tpu.memory_space<smem>>
      %417 = arith.index_cast %arg0 : i32 to index
      %c2_118 = arith.constant 2 : index
      %418 = arith.index_cast %c4_i32 : i32 to index
      %419 = memref.load %arg2[%417, %c2_118, %418] : memref<2x7x5xf32, #tpu.memory_space<smem>>
      %420 = arith.index_cast %arg0 : i32 to index
      %c3_119 = arith.constant 3 : index
      %421 = arith.index_cast %c4_i32 : i32 to index
      %422 = memref.load %arg2[%420, %c3_119, %421] : memref<2x7x5xf32, #tpu.memory_space<smem>>
      %423 = arith.index_cast %arg0 : i32 to index
      %c4_120 = arith.constant 4 : index
      %424 = arith.index_cast %c4_i32 : i32 to index
      %425 = memref.load %arg2[%423, %c4_120, %424] : memref<2x7x5xf32, #tpu.memory_space<smem>>
      %426 = arith.index_cast %arg0 : i32 to index
      %c5_121 = arith.constant 5 : index
      %427 = arith.index_cast %c4_i32 : i32 to index
      %428 = memref.load %arg2[%426, %c5_121, %427] : memref<2x7x5xf32, #tpu.memory_space<smem>>
      %429 = arith.index_cast %arg0 : i32 to index
      %c6_122 = arith.constant 6 : index
      %430 = arith.index_cast %c4_i32 : i32 to index
      %431 = memref.load %arg2[%429, %c6_122, %430] : memref<2x7x5xf32, #tpu.memory_space<smem>>
      %432 = vector.broadcast %419 : f32 to vector<8x128xf32>
      %433 = arith.addf %13, %432 : vector<8x128xf32>
      %434 = vector.broadcast %422 : f32 to vector<8x128xf32>
      %435 = arith.addf %16, %434 : vector<8x128xf32>
      %436 = vector.broadcast %425 : f32 to vector<8x128xf32>
      %437 = arith.addf %19, %436 : vector<8x128xf32>
      %438 = arith.mulf %433, %435 : vector<8x128xf32>
      %439 = arith.mulf %437, %437 : vector<8x128xf32>
      %440 = arith.subf %438, %439 : vector<8x128xf32>
      %cst_123 = arith.constant 1.000000e-07 : f32
      %441 = vector.broadcast %cst_123 : f32 to vector<8x128xf32>
      %442 = arith.addf %440, %441 : vector<8x128xf32>
      %443 = tpu.reciprocal %442 {approx = true} : vector<8x128xf32> -> vector<8x128xf32>
      %444 = vector.broadcast %413 : f32 to vector<8x128xf32>
      %445 = arith.subf %7, %444 : vector<8x128xf32>
      %446 = vector.broadcast %416 : f32 to vector<8x128xf32>
      %447 = arith.subf %10, %446 : vector<8x128xf32>
      %448 = arith.mulf %433, %447 : vector<8x128xf32>
      %449 = arith.mulf %448, %447 : vector<8x128xf32>
      %450 = arith.mulf %435, %445 : vector<8x128xf32>
      %451 = arith.mulf %450, %445 : vector<8x128xf32>
      %452 = arith.addf %449, %451 : vector<8x128xf32>
      %cst_124 = arith.constant 2.500000e-01 : f32
      %453 = vector.broadcast %cst_124 : f32 to vector<8x128xf32>
      %454 = arith.mulf %453, %443 : vector<8x128xf32>
      %455 = arith.mulf %452, %454 : vector<8x128xf32>
      %cst_125 = arith.constant 0.000000e+00 : f32
      %456 = vector.broadcast %cst_125 : f32 to vector<8x128xf32>
      %457 = arith.subf %456, %445 : vector<8x128xf32>
      %458 = arith.mulf %437, %457 : vector<8x128xf32>
      %459 = arith.mulf %458, %447 : vector<8x128xf32>
      %cst_126 = arith.constant 5.000000e-01 : f32
      %460 = vector.broadcast %cst_126 : f32 to vector<8x128xf32>
      %461 = arith.mulf %460, %443 : vector<8x128xf32>
      %462 = arith.mulf %459, %461 : vector<8x128xf32>
      %cst_127 = arith.constant 1.000000e-07 : f32
      %463 = vector.broadcast %cst_127 : f32 to vector<8x128xf32>
      %464 = arith.addf %440, %463 : vector<8x128xf32>
      %465 = math.log %464 : vector<8x128xf32>
      %cst_128 = arith.constant 5.000000e-01 : f32
      %466 = vector.broadcast %cst_128 : f32 to vector<8x128xf32>
      %467 = arith.mulf %466, %465 : vector<8x128xf32>
      %468 = arith.subf %467, %22 : vector<8x128xf32>
      %469 = vector.broadcast %428 : f32 to vector<8x128xf32>
      %470 = arith.subf %468, %469 : vector<8x128xf32>
      %471 = arith.addf %455, %462 : vector<8x128xf32>
      %472 = arith.addf %471, %470 : vector<8x128xf32>
      %cst_129 = arith.constant 1.000000e-07 : f32
      %cst_130 = arith.constant 1.000000e+02 : f32
      %473 = vector.broadcast %cst_129 : f32 to vector<8x128xf32>
      %474 = arith.maximumf %473, %472 : vector<8x128xf32>
      %475 = vector.broadcast %cst_130 : f32 to vector<8x128xf32>
      %476 = arith.minimumf %475, %474 : vector<8x128xf32>
      %cst_131 = arith.constant 0.000000e+00 : f32
      %477 = vector.broadcast %cst_131 : f32 to vector<8x128xf32>
      %478 = arith.subf %477, %476 : vector<8x128xf32>
      %479 = math.exp %478 : vector<8x128xf32>
      %cst_132 = arith.constant 1.000000e+00 : f32
      %480 = vector.broadcast %cst_132 : f32 to vector<8x128xf32>
      %481 = arith.subf %480, %479 : vector<8x128xf32>
      %cst_133 = arith.constant 1.000000e-07 : f32
      %482 = vector.broadcast %cst_133 : f32 to vector<8x128xf32>
      %483 = arith.addf %481, %482 : vector<8x128xf32>
      %484 = math.sqrt %483 : vector<8x128xf32>
      %cst_134 = arith.constant 1.000000e+00 : f32
      %485 = vector.broadcast %cst_134 : f32 to vector<8x128xf32>
      %486 = arith.subf %485, %484 : vector<8x128xf32>
      %487 = vector.broadcast %431 : f32 to vector<8x128xf32>
      %488 = arith.subf %487, %25 : vector<8x128xf32>
      %489 = arith.mulf %488, %488 : vector<8x128xf32>
      %cst_135 = arith.constant 0.405284733 : f32
      %490 = vector.broadcast %cst_135 : f32 to vector<8x128xf32>
      %491 = arith.mulf %490, %489 : vector<8x128xf32>
      %cst_136 = arith.constant 1.000000e+00 : f32
      %492 = vector.broadcast %cst_136 : f32 to vector<8x128xf32>
      %493 = arith.subf %492, %486 : vector<8x128xf32>
      %494 = arith.addf %491, %493 : vector<8x128xf32>
      %cst_137 = arith.constant 1.000000e-07 : f32
      %495 = vector.broadcast %cst_137 : f32 to vector<8x128xf32>
      %496 = arith.addf %494, %495 : vector<8x128xf32>
      %497 = tpu.reciprocal %496 {approx = true} : vector<8x128xf32> -> vector<8x128xf32>
      %498 = arith.mulf %491, %497 : vector<8x128xf32>
      %499 = arith.mulf %491, %498 : vector<8x128xf32>
      %500 = arith.subf %486, %499 : vector<8x128xf32>
      %c0_138 = arith.constant 0 : index
      %501 = arith.index_cast %c4_i32 : i32 to index
      %502 = arith.index_cast %4 : i32 to index
      %c0_139 = arith.constant 0 : index
      %503 = vector.load %arg5[%c0_138, %501, %502, %c0_139] : memref<1x5x16x128xf32, #tpu.memory_space<vmem>>, vector<1x1x8x128xf32>
      %504 = vector.shape_cast %503 : vector<1x1x8x128xf32> to vector<8x128xf32>
      %505 = vector.shape_cast %500 : vector<8x128xf32> to vector<1x1x8x128xf32>
      tpu.vector_store %arg5[%c0_138, %501, %502, %c0_139], %505 {strides = array<i32>} : memref<1x5x16x128xf32, #tpu.memory_space<vmem>>, vector<1x1x8x128xf32>,
      %506 = arith.addf %410, %500 : vector<8x128xf32>
      %c5_i32 = arith.constant 5 : i32
      %cst_140 = arith.constant 5.000000e+00 : f32
      %507 = vector.broadcast %cst_140 : f32 to vector<8x128xf32>
      %508 = arith.subf %507, %506 : vector<8x128xf32>
      %cst_141 = arith.constant 2.000000e-01 : f32
      %509 = vector.broadcast %cst_141 : f32 to vector<8x128xf32>
      %510 = arith.mulf %508, %509 : vector<8x128xf32>
      %c0_142 = arith.constant 0 : index
      %511 = arith.index_cast %4 : i32 to index
      %c0_143 = arith.constant 0 : index
      %512 = vector.load %arg4[%c0_142, %511, %c0_143] : memref<1x16x128xf32, #tpu.memory_space<vmem>>, vector<1x8x128xf32>
      %513 = vector.shape_cast %512 : vector<1x8x128xf32> to vector<8x128xf32>
      %514 = vector.shape_cast %510 : vector<8x128xf32> to vector<1x8x128xf32>
      tpu.vector_store %arg4[%c0_142, %511, %c0_143], %514 {strides = array<i32>} : memref<1x16x128xf32, #tpu.memory_space<vmem>>, vector<1x8x128xf32>,
    }
    %c2_i32_0 = arith.constant 2 : i32
    return
  }
  func.func @transform_0(%arg0: i32, %arg1: i32) -> (i32, i32, i32) {
    %c0_i32 = arith.constant 0 : i32
    %c0_i32_0 = arith.constant 0 : i32
    %c0_i32_1 = arith.constant 0 : i32
    %c0_i32_2 = arith.constant 0 : i32
    return %c0_i32, %c0_i32_0, %c0_i32_1 : i32, i32, i32
  }
  func.func @transform_1(%arg0: i32, %arg1: i32) -> (i32, i32, i32, i32) {
    %c0_i32 = arith.constant 0 : i32
    %c0_i32_0 = arith.constant 0 : i32
    %c0_i32_1 = arith.constant 0 : i32
    return %arg0, %c0_i32, %arg1, %c0_i32_0 : i32, i32, i32, i32
  }
  func.func @transform_2(%arg0: i32, %arg1: i32) -> (i32, i32, i32) {
    %c0_i32 = arith.constant 0 : i32
    %c0_i32_0 = arith.constant 0 : i32
    return %arg0, %arg1, %c0_i32 : i32, i32, i32
  }
  func.func @transform_3(%arg0: i32, %arg1: i32) -> (i32, i32, i32, i32) {
    %c0_i32 = arith.constant 0 : i32
    %c0_i32_0 = arith.constant 0 : i32
    %c0_i32_1 = arith.constant 0 : i32
    return %arg0, %c0_i32, %arg1, %c0_i32_0 : i32, i32, i32, i32
  }
}

</mosaic_0001>

<bundles_post_ra>
// kernel: tpu_custom_call.1
= control target key start
LH: loop header
LB: loop body
LE: loop exit
PB: predicated region body
PF: predicated region fallthrough
CT: control target
= control target key end

     0   :  { %s1754_s0 = inlined_call_operand.vmem [shape: f32[2,7,5], index: 0, kind: input, shape index: {}]   ;;  %s1755_s1 = inlined_call_operand.hbm [shape: f32[2,7,16,128], index: 1, kind: input, shape index: {}]   ;;  %s1756_s2 = inlined_call_operand.hbm [shape: f32[2,16,128], index: 2, kind: output, shape index: {0}]   ;;  %s1757_s3 = inlined_call_operand.hbm [shape: f32[2,5,16,128], index: 3, kind: output, shape index: {1}]  }
   0x1   :  { %1764 = sst [smem:[#allocation21_spill]] %s1754_s0 }
   0x2   :  { %1765 = sst [smem:[#allocation22_spill]] %s1755_s1 }
   0x3   :  { %9 = vsyncpa [#allocation5], 0 }
   0x4   :  { %10 = vsyncpa [#allocation3], 0 }
   0x5   :  { %12 = vsyncpa [#allocation3 + $0x1], 0 }
   0x6   :  { %13 = vsyncpa [#allocation4], 0 }
   0x7   :  { %15 = vsyncpa [#allocation4 + $0x1], 0 }
   0x8   :  { %16 = vsyncpa [#allocation9], 0 }
   0x9   :  { %18 = vsyncpa [#allocation9 + $0x1], 0  ;;  %s1319_s12 = smov 0   ;;  %s1321_s13 = smov 0  }
   0xa   :  { %s1323_s14 = smov 0   ;;  %s1325_s15 = smov 0  }
   0xb   :  { %s1327_s16 = smov 0   ;;  %s1329_s17 = smov 0  }
   0xc LB: > { %1766 = sst [smem:[#allocation14_spill]] %s1272_s13  ;;  %s912_s18 = sadd.s32 4294967295, %s1288_s17   ;;  %s1288_s17 = sphi %s1329_s17, %s24_s17   ;;  %s1284_s16 = sphi %s1327_s16, %s1787_s16   ;;  %s1280_s15 = sphi %s1325_s15, %s1786_s15   ;;  %s1276_s14 = sphi %s1323_s14, %s1785_s14   ;;  %s1272_s13 = sphi %s1321_s13, %s1784_s13   ;;  %s1268_s12 = sphi %s1319_s12, %s1783_s12  }
   0xd   : > { %1767 = sst [smem:[#allocation15_spill]] %s1276_s14  ;;  %s913_s19 = sadd.s32 4294967294, %s1288_s17  }
   0xe   : > { %1768 = sst [smem:[#allocation16_spill]] %s1284_s16  ;;  %p79_p0 = scmp.ne.s32.totalorder %s1272_s13, %s1268_s12 }
   0xf   : > { %1769 = sst [smem:[#allocation17_spill]] %s1288_s17  ;;  %p1353_p1 = scmp.eq.s32.totalorder %s912_s18, 0 }
  0x10   : > { %p1357_p2 = scmp.eq.s32.totalorder %s912_s18, 1  ;;  %p111_p3 = scmp.eq.s32.totalorder %s913_s19, 1 }
  0x11   : > { %p1363_p4 = por %p1353_p1, %p79_p0  ;;  %p914_p5 = scmp.ge.s32.totalorder %s1288_s17, 1 }
  0x12   : > { %p1368_p6 = por %p111_p3, %p79_p0  ;;  %p146_p7 = scmp.lt.s32.totalorder %s1288_s17, 3 }
  0x13   : > { %s1774_s0 = sld [smem:[#allocation21_spill]]  ;;  %p916_p10 = scmp.ge.s32.totalorder %s1288_s17, 2 }
  0x14   : > { %p1376_p8 = pnand %p914_p5, %p146_p7  ;;  %s36_s28 = sadd.s32 1, %s1284_s16 }
  0x15   : > { %s1294_s29 = smov [#allocation2]   ;;  %s1295_s30 = smov 128  }
  0x16   : > { %p991_p9 = pneg %p1376_p8  ;;  %s1296_s4 = smov 8  }
  0x17   : > { %p38_p12 = scmp.ge.s32.totalorder %s36_s28, 2  ;;  %s66_s5 = sadd.s32 1, %s1276_s14 }
  0x18   : > { %p992_p11 = pnand %p991_p9, %p1353_p1  ;;  %p73_p13 = scmp.ne.s32.totalorder %s1276_s14, %s1272_s13 }
  0x19   : > { %s157_s26 = sshll.u32 %s1774_s0, 4  ;;  %p74_p0 = scmp.eq.s32.totalorder %s1288_s17, 0  ;;  %s158_s26 = int_to_ptr.vmem [resolvable:$true] %s157_s26 }
  0x1a   : > { %994 = dma.vmem_to_smem (!%p992_p11), %s158_s26, 256, %s1294_s29, [#allocation5], %s1295_s30, %s1295_s30, %s1296_s4  }
  0x1b   : > { %s1789_s28 = smov (%p38_p12, %s36_s28), 0  ;;  %p75_p3 = por %p74_p0, %p73_p13 }
  0x1c   : > { %1776 = sst [smem:[#allocation18_spill]] %s1789_s28  ;;  %p1394_p5 = por %p1357_p2, %p73_p13 }
  0x1d   : > { %s61_s7 = ssub.s32 %s1284_s16, %s1789_s28  ;;  %p1007_p7 = scmp.lt.s32.totalorder %s1288_s17, 2 }
  0x1e   : > { %p64_p9 = scmp.eq.s32.totalorder %s61_s7, 0  ;;  %s171_s8 = sand.u32 1, %s1276_s14  }
  0x1f   : > { %s976_s9 = smul.u32 112, %s171_s8  ;;  %p996_p11 = pnand %p1007_p7, %p75_p3 }
  0x20   : > { %s1403_s10 = scalar_select %p64_p9, %s1276_s14, %s66_s5  }
  0x21   : > { %s977_s11 = smul.u32 112, %s1284_s16  ;;  %s175_s18 = scalar_lea.vmem [#allocation6], %s976_s9 }
  0x22   : > { %1778 = sst [smem:[#allocation19_spill]] %s1403_s10  ;;  %s185_s19 = sshll.u32 %s175_s18, 4  ;;  %s186_s19 = int_to_ptr.vmem [resolvable:$true] %s185_s19 }
  0x23   : > { %s1779_s1 = sld [smem:[#allocation22_spill]]  ;;  %s172_s29 = scalar_lea.sflag [#allocation3], %s171_s8 }
  0x27   : > { %197 = sbr.rel (%p1376_p8) target bundleno = 223 (0xdf), region = 28 }
  0x29   : > { %s182_s26 = scalar_lea.hbm %s1779_s1, %s977_s11 }
  0x2a   : > { %s183_s21 = sshll.u32 %s182_s26, 4  ;;  %s184_s21 = int_to_ptr.hbm [resolvable:$true] %s183_s21 }
  0x2b   : > { %998 = dma.hbm_to_vmem [thread:$0]  (!%p996_p11), %s184_s21, 1792, %s186_s19, %s172_s29, %s1295_s30, %s1295_s30, %s1296_s4  }
  0x2c   : > { %1251 = dma.done.wait (%p1353_p1), [#allocation5], 256  }
  0x2d   : > { %1253 = vsyncadd (%p1353_p1), [#allocation5], 4294967040  ;;  %s1416_s5 = sand.u32 1, %s1272_s13  }
  0x2e   : > { %s978_s7 = smul.u32 112, %s1416_s5  ;;  %s205_s9 = scalar_lea.sflag [#allocation3], %s1416_s5 }
  0x30   : > { %s1420_s11 = scalar_lea.vmem [#allocation6], %s978_s7 }
  0x31   : > { %1780 = sst [smem:[#allocation20_spill]] %s1420_s11 }
  0x32   : > { %1255 = dma.done.wait (%p1363_p4), %s205_s9, 1792  }
  0x33   : > { %1257 = vsyncadd (%p1363_p4), %s205_s9, 4294965504 }
  0x34   : > { %214 = sfence }
  0x35   : > { %s920_s20 = sshll.u32 %s1416_s5, 4  ;;  %s979_s27 = smul.u32 80, %s1416_s5 }
  0x36   : > { %s1428_s30 = scalar_lea.vmem [#allocation7], %s920_s20  ;;  %s1432_s8 = smov 0  }
  0x37   : > { %s1430_s4 = scalar_lea.vmem [#allocation8], %s979_s27 }
  0x38 LB: >> { %s1781_s11 = sld [smem:[#allocation20_spill]]  ;;  %s1438_s22 = sshll.u32 %s1280_s15, 10  ;;  %s1292_s8 = sphi %s1432_s8, %s246_s8  }
  0x39   : >> { %s270_s18 = sld [smem:[#allocation2 + %s1438_s22]]  ;;  %s1442_s19 = sadd.s32 128, %s1438_s22 }
  0x3a   : >> { %s1445_s24 = sshll.u32 %s1292_s8, 3  ;;  %s273_s25 = sld [smem:[#allocation2 + %s1442_s19]] }
  0x3b   : >> { %s1449_s26 = sadd.s32 256, %s1438_s22  ;;  %s1452_s21 = sadd.s32 384, %s1438_s22 }
  0x3c   : >> { %s276_s29 = sld [smem:[#allocation2 + %s1449_s26]]  ;;  %s1456_s7 = sadd.s32 512, %s1438_s22 }
  0x3d   : >> { %s279_s20 = sld [smem:[#allocation2 + %s1452_s21]]  ;;  %s1474_s0 = sadd.s32 640, %s1438_s22 }
  0x3e   : >> { %s1460_s9 = scalar_lea.vmem %s1781_s11, %s1445_s24  ;;  %s282_s27 = sld [smem:[#allocation2 + %s1456_s7]] }
  0x3f   : >> { %v1465_v0 = vld [vmem:[%s1460_s9] sm:$0xff]  ;;  %v1468_v1 = vld [vmem:[%s1460_s9 + $0x10] sm:$0xff]  ;;  %v300_v2 = vstv %s270_s18  ;;  %s358_s1 = sadd.s32 1, %s1438_s22  ;;  %s360_s28 = sadd.s32 1, %s1442_s19 }
  0x40   : >> { %v1471_v3 = vld [vmem:[%s1460_s9 + $0x20] sm:$0xff]  ;;  %v302_v4 = vstv %s273_s25  ;;  %v1478_v5 = vld [vmem:[%s1460_s9 + $0x30] sm:$0xff]  ;;  %s1480_s11 = sld [smem:[#allocation2 + %s358_s1]]  ;;  %v301_v8 = vsub.f32 %v1465_v0, %v300_v2  ;;  %s362_s16 = sadd.s32 1, %s1449_s26 }
  0x41   : >> { %v1484_v6 = vld [vmem:[%s1460_s9 + $0x40] sm:$0xff]  ;;  %v303_v9 = vsub.f32 %v1468_v1, %v302_v4  ;;  %s361_s18 = sld [smem:[#allocation2 + %s360_s28]]  ;;  %s364_s10 = sadd.s32 1, %s1452_s21 }
  0x42   : >> { %v289_v7 = vstv %s276_s29  ;;  %s363_s25 = sld [smem:[#allocation2 + %s362_s16]]  ;;  %s366_s29 = sadd.s32 1, %s1456_s7  ;;  %v311_v17 = vsub.f32 0.0, %v301_v8 }
  0x43   : >> { %v290_v10 = vadd.f32 %v1471_v3, %v289_v7  ;;  %v291_v11 = vstv %s279_s20  ;;  %s1492_s1 = sld [smem:[#allocation2 + %s364_s10]]  ;;  %s368_s28 = sadd.s32 1, %s1474_s0 }
  0x44   : >> { %v292_v12 = vadd.f32 %v1478_v5, %v291_v11  ;;  %v293_v13 = vstv %s282_s27  ;;  %s1496_s14 = sld [smem:[#allocation2 + %s366_s29]]  ;;  %s441_s10 = sadd.s32 2, %s1438_s22 }
  0x45   : >> { %v294_v14 = vadd.f32 %v1484_v6, %v293_v13  ;;  %s1500_s13 = sld [smem:[#allocation2 + %s1474_s0]]  ;;  %v304_v16 = vmul.f32 %v303_v9, %v290_v10  ;;  %s443_s27 = sadd.s32 2, %s1442_s19 }
  0x46   : >> { %v295_v15 = vmul.f32 %v292_v12, %v290_v10  ;;  %v306_v19 = vmul.f32 %v301_v8, %v292_v12  ;;  %s1502_s16 = sld [smem:[#allocation2 + %s368_s28]]  ;;  %v383_v20 = vstv %s1480_s11  ;;  %s445_s17 = sadd.s32 2, %s1449_s26  ;;  %v1558_v10 = vld [vmem:[%s1460_s9 + $0x50] sm:$0xff] }
  0x47   : >> { %v296_v18 = vmul.f32 %v294_v14, %v294_v14  ;;  %v385_v21 = vstv %s361_s18  ;;  %s1506_s20 = sld [smem:[#allocation2 + %s441_s10]]  ;;  %v384_v24 = vsub.f32 %v1465_v0, %v383_v20  ;;  %v305_v26 = vmul.f32 %v304_v16, %v303_v9  ;;  %s447_s18 = sadd.s32 2, %s1452_s21 }
  0x48   : >> { %v372_v23 = vstv %s363_s25  ;;  %v386_v25 = vsub.f32 %v1468_v1, %v385_v21  ;;  %s1511_s29 = sld [smem:[#allocation2 + %s443_s27]]  ;;  %v312_v27 = vmul.f32 %v311_v17, %v294_v14  ;;  %v307_v31 = vmul.f32 %v306_v19, %v301_v8  ;;  %s449_s28 = sadd.s32 2, %s1456_s7 }
  0x49   : >> { %v297_v22 = vsub.f32 %v295_v15, %v296_v18  ;;  %v373_v28 = vadd.f32 %v1471_v3, %v372_v23  ;;  %v374_v29 = vstv %s1492_s1  ;;  %s1516_s11 = sld [smem:[#allocation2 + %s445_s17]]  ;;  %v394_v37 = vsub.f32 0.0, %v384_v24  ;;  %s526_s1 = sadd.s32 3, %s1442_s19 }
  0x4a   : >> { %v375_v32 = vadd.f32 %v1478_v5, %v374_v29  ;;  %v376_v33 = vstv %s1496_s14  ;;  %s1521_s25 = sld [smem:[#allocation2 + %s447_s18]]  ;;  %s524_s14 = sadd.s32 3, %s1438_s22  ;;  %v308_v41 = vadd.f32 %v307_v31, %v305_v26  ;;  %v313_v42 = vmul.f32 %v312_v27, %v303_v9 }
  0x4b   : >> { %v298_v30 = vadd.f32 1e-07, %v297_v22  ;;  %v377_v34 = vadd.f32 %v1484_v6, %v376_v33  ;;  %v387_v35 = vmul.f32 %v386_v25, %v373_v28  ;;  %s1525_s10 = sld [smem:[#allocation2 + %s449_s28]]  ;;  %v320_v38 = vstv %s1500_s13  ;;  %s528_s27 = sadd.s32 3, %s1449_s26 }
  0x4c   : >> { %v378_v36 = vmul.f32 %v375_v32, %v373_v28  ;;  %v389_v40 = vmul.f32 %v384_v24, %v375_v32  ;;  %s1531_s17 = sld [smem:[#allocation2 + %s524_s14]]  ;;  %s532_s18 = sadd.s32 3, %s1456_s7  ;;  %v403_v58 = vstv %s1502_s16 }
  0x4d   : >> { %1071 = vrcp.f32 %v298_v30  ;;  %v379_v39 = vmul.f32 %v377_v34, %v377_v34  ;;  %v466_v43 = vstv %s1506_s20  ;;  %v388_v46 = vmul.f32 %v387_v35, %v386_v25  ;;  %s1542_s20 = sld [smem:[#allocation2 + %s528_s27]]  ;;  %s613_s14 = sadd.s32 4, %s1452_s21 }
  0x4e   : >> { %1073 = vlog2.f32 %v298_v30  ;;  %v468_v44 = vstv %s1511_s29  ;;  %v467_v48 = vsub.f32 %v1465_v0, %v466_v43  ;;  %v395_v49 = vmul.f32 %v394_v37, %v377_v34  ;;  %s530_s29 = sadd.s32 3, %s1452_s21  ;;  %s1555_s28 = sld [smem:[#allocation2 + %s526_s1]] }
  0x4f   : >> { %v380_v45 = vsub.f32 %v378_v36, %v379_v39  ;;  %v455_v47 = vstv %s1516_s11  ;;  %v1540_v52 = vsub.f32 %v1468_v1, %v468_v44  ;;  %v390_v54 = vmul.f32 %v389_v40, %v384_v24  ;;  %s1547_s11 = sld [smem:[#allocation2 + %s530_s29]]  ;;  %s451_s1 = sadd.s32 2, %s1474_s0 }
  0x50   : >> { %v456_v50 = vadd.f32 %v1471_v3, %v455_v47  ;;  %v457_v51 = vstv %s1521_s25  ;;  %v477_v61 = vsub.f32 0.0, %v467_v48  ;;  %s1553_s25 = sld [smem:[#allocation2 + %s532_s18]]  ;;  %v396_v8 = vmul.f32 %v395_v49, %v386_v25  ;;  %s615_s13 = sadd.s32 4, %s1456_s7 }
  0x51   : >> { %v381_v53 = vadd.f32 1e-07, %v380_v45  ;;  %v458_v55 = vadd.f32 %v1478_v5, %v457_v51  ;;  %v459_v56 = vstv %s1525_s10  ;;  %v391_v13 = vadd.f32 %v390_v54, %v388_v46  ;;  %s611_s10 = sadd.s32 4, %s1449_s26  ;;  %s1577_s21 = sld [smem:[#allocation2 + %s613_s14]] }
  0x52   : >> { %v460_v59 = vadd.f32 %v1484_v6, %v459_v56  ;;  %v470_v60 = vmul.f32 %v1540_v52, %v456_v50  ;;  %v549_v18 = vstv %s1531_s17  ;;  %s1573_s26 = sld [smem:[#allocation2 + %s611_s10]]  ;;  %s607_s17 = sadd.s32 4, %s1438_s22 }
  0x53   : >> { %v1072_v57 = vpop.eup %1071  ;;  %1075 = vrcp.f32 %v381_v53  ;;  %v461_v4 = vmul.f32 %v458_v55, %v456_v50  ;;  %v472_v14 = vmul.f32 %v467_v48, %v458_v55  ;;  %v538_v17 = vstv %s1542_s20  ;;  %s1580_s27 = sld [smem:[#allocation2 + %s451_s1]]  ;;  %s609_s20 = sadd.s32 4, %s1442_s19 }
  0x54   : >> { %v1074_v62 = vpop.eup %1073  ;;  %v309_v63 = vmul.f32 0.25, %v1072_v57  ;;  %v314_v2 = vmul.f32 0.5, %v1072_v57  ;;  %1077 = vlog2.f32 %v381_v53  ;;  %v462_v9 = vmul.f32 %v460_v59, %v460_v59  ;;  %s1587_s29 = sld [smem:[#allocation2 + %s607_s17]]  ;;  %s1613_s18 = sadd.s32 768, %s1438_s22 }
  0x55   : >> { %v317_v7 = vmul.f32 0.6931472, %v1074_v62  ;;  %v471_v20 = vmul.f32 %v470_v60, %v1540_v52  ;;  %v478_v21 = vmul.f32 %v477_v61, %v460_v59  ;;  %v539_v22 = vadd.f32 %v1471_v3, %v538_v17  ;;  %s1590_s7 = sld [smem:[#allocation2 + %s615_s13]]  ;;  %s617_s22 = sadd.s32 4, %s1474_s0 }
  0x56   : >> { %v310_v11 = vmul.f32 %v309_v63, %v308_v41  ;;  %v315_v12 = vmul.f32 %v314_v2, %v313_v42  ;;  %v463_v16 = vsub.f32 %v461_v4, %v462_v9  ;;  %v540_v25 = vstv %s1547_s11  ;;  %s1592_s19 = sld [smem:[#allocation2 + %s609_s20]]  ;;  %s534_s11 = sadd.s32 3, %s1474_s0 }
  0x57   : >> { %v318_v15 = vmul.f32 0.5, %v317_v7  ;;  %v542_v26 = vstv %s1553_s25  ;;  %v473_v28 = vmul.f32 %v472_v14, %v467_v48  ;;  %v541_v29 = vadd.f32 %v1478_v5, %v540_v25  ;;  %s1602_s16 = sld [smem:[#allocation2 + %s534_s11]]  ;;  %s453_s0 = sadd.s32 2, %s1613_s18 }
  0x58   : >> { %v322_v19 = vadd.f32 %v315_v12, %v310_v11  ;;  %v464_v24 = vadd.f32 1e-07, %v463_v16  ;;  %v543_v30 = vadd.f32 %v1484_v6, %v542_v26  ;;  %v550_v31 = vsub.f32 %v1465_v0, %v549_v18  ;;  %s1620_s25 = sld [smem:[#allocation2 + %s1613_s18]]  ;;  %s536_s1 = sadd.s32 3, %s1613_s18 }
  0x59   : >> { %v319_v23 = vsub.f32 %v318_v15, %v1558_v10  ;;  %v1076_v27 = vpop.eup %1075  ;;  %v544_v37 = vmul.f32 %v541_v29, %v539_v22  ;;  %v551_v43 = vstv %s1555_s28  ;;  %v474_v48 = vadd.f32 %v473_v28, %v471_v20  ;;  %s370_s28 = sadd.s32 1, %s1613_s18  ;;  %s1626_s10 = sld [smem:[#allocation2 + %s617_s22]] }
  0x5a   : >> { %v1078_v32 = vpop.eup %1077  ;;  %v392_v34 = vmul.f32 0.25, %v1076_v27  ;;  %v397_v35 = vmul.f32 0.5, %v1076_v27  ;;  %1079 = vrcp.f32 %v464_v24  ;;  %v545_v39 = vmul.f32 %v543_v30, %v543_v30  ;;  %s1628_s14 = sld [smem:[#allocation2 + %s370_s28]]  ;;  %s619_s17 = sadd.s32 4, %s1613_s18 }
  0x5b   : >> { %v321_v33 = vsub.f32 %v319_v23, %v320_v38  ;;  %v400_v36 = vmul.f32 0.6931472, %v1078_v32  ;;  %1081 = vlog2.f32 %v464_v24  ;;  %v552_v45 = vsub.f32 %v1468_v1, %v551_v43  ;;  %s692_s13 = scalar_lea.vmem %s1428_s30, %s1445_s24 [#allocation7]  ;;  %s246_s8 = sadd.s32 1, %s1292_s8  }
  0x5c   : >> { %v393_v41 = vmul.f32 %v392_v34, %v391_v13  ;;  %v398_v42 = vmul.f32 %v397_v35, %v396_v8  ;;  %v546_v38 = vsub.f32 %v544_v37, %v545_v39  ;;  %v555_v46 = vmul.f32 %v550_v31, %v541_v29  ;;  %p243_p1 = scmp.ge.s32.totalorder %s246_s8, 2  }
  0x5d   : >> { %v323_v40 = vadd.f32 %v322_v19, %v321_v33  ;;  %v401_v44 = vmul.f32 0.5, %v400_v36  ;;  %v479_v49 = vmul.f32 %v478_v21, %v1540_v52  ;;  %v560_v50 = vsub.f32 0.0, %v550_v31  ;;  %s969_s20 = sshll.u32 (%p243_p1), %s1280_s15, 4  ;;  %s714_s11 = sshll.u32 (%p243_p1), %s1428_s30, 4  ;;  %s715_s11 = int_to_ptr.vmem [resolvable:$true] %s714_s11 }
  0x5e   : >> { %v405_v53 = vadd.f32 %v398_v42, %v393_v41  ;;  %v547_v54 = vadd.f32 1e-07, %v546_v38  ;;  %v553_v55 = vmul.f32 %v552_v45, %v539_v22  ;;  %v556_v59 = vmul.f32 %v555_v46, %v550_v31  ;;  %s1186_s28 = scalar_lea.hbm (%p243_p1), %s1756_s2, 32 }
  0x5f   : >> { %v324_v47 = vmax.f32 %v323_v40, 1e-07  ;;  %v402_v51 = vsub.f32 %v401_v44, %v1558_v10  ;;  %v561_v60 = vmul.f32 %v560_v50, %v543_v30  ;;  %v621_v7 = vstv %s1573_s26  ;;  %s1668_s26 = sld [smem:[#allocation2 + %s536_s1]] }
  0x60   : >> { %v1080_v56 = vpop.eup %1079  ;;  %1083 = vrcp.f32 %v547_v54  ;;  %v623_v8 = vstv %s1577_s21  ;;  %v554_v13 = vmul.f32 %v553_v55, %v552_v45  ;;  %v486_v16 = vstv %s1580_s27  ;;  %s1680_s21 = scalar_lea.vmem %s1430_s4, %s1445_s24 [#allocation8]  ;;  %s620_s27 = sld [smem:[#allocation2 + %s619_s17]] }
  0x61   : >> { %v325_v57 = vmin.f32 %v324_v47, 100.0  ;;  %v1082_v52 = vpop.eup %1081  ;;  %v404_v61 = vsub.f32 %v402_v51, %v403_v58  ;;  %v475_v62 = vmul.f32 0.25, %v1080_v56  ;;  %v480_v63 = vmul.f32 0.5, %v1080_v56 }
  0x62   : >> { %v483_v4 = vmul.f32 0.6931472, %v1082_v52  ;;  %v562_v18 = vmul.f32 %v561_v60, %v552_v45  ;;  %1085 = vlog2.f32 %v547_v54  ;;  %v622_v58 = vadd.f32 %v1471_v3, %v621_v7 }
  0x63   : >> { %v326_v2 = vsub.f32 0.0, %v325_v57  ;;  %v406_v9 = vadd.f32 %v405_v53, %v404_v61  ;;  %v476_v11 = vmul.f32 %v475_v62, %v474_v48  ;;  %v481_v12 = vmul.f32 %v480_v63, %v479_v49 }
  0x64   : >> { %v484_v15 = vmul.f32 0.5, %v483_v4  ;;  %v624_v21 = vadd.f32 %v1478_v5, %v623_v8  ;;  %v557_v24 = vadd.f32 %v556_v59, %v554_v13  ;;  %v625_v25 = vstv %s1590_s7 }
  0x65   : >> { %v327_v14 = vmul.f32 1.442695, %v326_v2  ;;  %v407_v17 = vmax.f32 %v406_v9, 1e-07  ;;  %v488_v20 = vadd.f32 %v481_v12, %v476_v11  ;;  %v632_v26 = vstv %s1587_s29 }
  0x66   : >> { %v485_v19 = vsub.f32 %v484_v15, %v1558_v10  ;;  %v1084_v22 = vpop.eup %1083  ;;  %v634_v30 = vstv %s1592_s19  ;;  %v626_v3 = vadd.f32 %v1484_v6, %v625_v25  ;;  %v627_v32 = vmul.f32 %v624_v21, %v622_v58  ;;  %s713_s19 = scalar_lea.hbm (%p243_p1), %s1756_s2, %s969_s20 }
  0x67   : >> { %1087 = vpow2.f32 %v327_v14  ;;  %v408_v23 = vmin.f32 %v407_v17, 100.0  ;;  %v558_v28 = vmul.f32 0.25, %v1084_v22  ;;  %v563_v29 = vmul.f32 0.5, %v1084_v22  ;;  %s716_s24 = sshll.u32 (%p243_p1), %s713_s19, 4  ;;  %s717_s24 = int_to_ptr.hbm [resolvable:$true] %s716_s24 }
  0x68   : >> { %v487_v27 = vsub.f32 %v485_v19, %v486_v16  ;;  %v1086_v34 = vpop.eup %1085  ;;  %v628_v36 = vmul.f32 %v626_v3, %v626_v3  ;;  %v633_v5 = vsub.f32 %v1465_v0, %v632_v26  ;;  %v635_v37 = vsub.f32 %v1468_v1, %v634_v30  ;;  %s1180_s18 = sshra.s32 (%p243_p1), %s717_s24, 4  ;;  %s1181_s18 = int_to_ptr.hbm [resolvable:$true] %s1180_s18 }
  0x69   : >> { %v409_v31 = vsub.f32 0.0, %v408_v23  ;;  %v559_v41 = vmul.f32 %v558_v28, %v557_v24  ;;  %v564_v42 = vmul.f32 %v563_v29, %v562_v18  ;;  %v566_v43 = vmul.f32 0.6931472, %v1086_v34  ;;  %p1187_p12 = scmp.lt.s32.totalorder (%p243_p1), %s1181_s18, %s1756_s2 }
  0x6a   : >> { %v489_v33 = vadd.f32 %v488_v20, %v487_v27  ;;  %v629_v38 = vsub.f32 %v627_v32, %v628_v36  ;;  %v569_v46 = vstv %s1602_s16  ;;  %v636_v48 = vmul.f32 %v635_v37, %v622_v58  ;;  %v1634_v58 = vld [vmem:[%s1460_s9 + $0x60] sm:$0xff]  ;;  %s1644_s9 = sld [smem:[#allocation2 + %s453_s0]]  ;;  %s695_s16 = scalar_lea.sflag (%p243_p1), [#allocation4], %s1416_s5 }
  0x6b   : >> { %v410_v35 = vmul.f32 1.442695, %v409_v31  ;;  %v567_v45 = vmul.f32 0.5, %v566_v43  ;;  %v638_v1 = vmul.f32 %v633_v5, %v624_v21  ;;  %v571_v51 = vadd.f32 %v564_v42, %v559_v41 }
  0x6c   : >> { %v490_v40 = vmax.f32 %v489_v33, 1e-07  ;;  %v630_v0 = vadd.f32 1e-07, %v629_v38  ;;  %v643_v53 = vsub.f32 0.0, %v633_v5  ;;  %v637_v57 = vmul.f32 %v636_v48, %v635_v37 }
  0x6d   : >> { %v1088_v39 = vpop.eup %1087  ;;  %1089 = vpow2.f32 %v410_v35  ;;  %v568_v50 = vsub.f32 %v567_v45, %v1558_v10  ;;  %v639_v59 = vmul.f32 %v638_v1, %v633_v5  ;;  %v344_v17 = vstv %s1620_s25  ;;  %s1182_s25 = scalar_lea.hbm (%p243_p1), %s1181_s18, 16 }
  0x6e   : >> { %v329_v44 = vsub.f32 1.0, %v1088_v39  ;;  %v491_v6 = vmin.f32 %v490_v40, 100.0  ;;  %v644_v60 = vmul.f32 %v643_v53, %v626_v3  ;;  %v345_v29 = vsub.f32 %v344_v17, %v1634_v58  ;;  %p1183_p2 = scmp.ne.s32.totalorder (%p243_p1), %s1181_s18, %s1182_s25  ;;  %p1188_p13 = scmp.lt.s32.totalorder (%p243_p1), %s1186_s28, %s1182_s25 }
  0x6f   : >> { %v570_v55 = vsub.f32 %v568_v50, %v569_v46  ;;  %v640_v4 = vadd.f32 %v639_v59, %v637_v57  ;;  %v652_v31 = vstv %s1626_s10  ;;  %v427_v32 = vstv %s1628_s14 }
  0x70   : >> { %v1615_v47 = vadd.f32 1e-07, %v329_v44  ;;  %v492_v49 = vsub.f32 0.0, %v491_v6  ;;  %v645_v7 = vmul.f32 %v644_v60, %v635_v37  ;;  %v428_v39 = vsub.f32 %v427_v32, %v1634_v58  ;;  %p1184_p4 = pnand (%p243_p1), %p1183_p2, %p1394_p5  ;;  %p1189_p0 = por (%p243_p1), %p1188_p13, %p1187_p12 }
  0x71   : >> { %v572_v61 = vadd.f32 %v571_v51, %v570_v55  ;;  %v510_v50 = vstv %s1644_s9 }
  0x72   : >> { %1091 = vrsqrt.f32 %v1615_v47  ;;  %v493_v54 = vmul.f32 1.442695, %v492_v49  ;;  %vm338_vm0 = vcmp.eq.f32.partialorder %v1615_v47, inf  ;;  %v341_v35 = vand.u32 2147483648, %v1615_v47  ;;  %p1185_p8 = pneg (%p243_p1), %p1184_p4 }
  0x73   : >> { %1093 = vrcp.f32 %v630_v0  ;;  %v1090_v56 = vpop.eup %1089  ;;  %v573_v63 = vmax.f32 %v572_v61, 1e-07  ;;  %vm340_vm1 = vcmp.eq.f32.partialorder %v1615_v47, 0.0  ;;  %v429_v48 = vmul.f32 %v428_v39, %v428_v39 }
  0x74   : >> { %1095 = vlog2.f32 %v630_v0  ;;  %v412_v52 = vsub.f32 1.0, %v1090_v56  ;;  %p1190_p3 = pnand (%p243_p1), %p1189_p0, %p1185_p8 }
  0x75   : >> { %1097 = vpow2.f32 %v493_v54  ;;  %v574_v12 = vmin.f32 %v573_v63, 100.0 }
  0x76   : >> { %v1624_v62 = vadd.f32 1e-07, %v412_v52 }
  0x77   : >> { %v575_v20 = vsub.f32 0.0, %v574_v12 }
  0x78   : >> { %v1092_v2 = vpop.eup %1091  ;;  %1099 = vrsqrt.f32 %v1624_v62  ;;  %vm421_vm2 = vcmp.eq.f32.partialorder %v1624_v62, inf  ;;  %vm423_vm3 = vcmp.eq.f32.partialorder %v1624_v62, 0.0 }
  0x79   : >> { %v1094_v8 = vpop.eup %1093  ;;  %v332_v9 = vmul.f32 %v1092_v2, %v1615_v47  ;;  %v576_v26 = vmul.f32 1.442695, %v575_v20 }
  0x7a   : >> { %v1096_v11 = vpop.eup %1095  ;;  %v641_v13 = vmul.f32 0.25, %v1094_v8  ;;  %v646_v14 = vmul.f32 0.5, %v1094_v8 }
  0x7b   : >> { %v1098_v15 = vpop.eup %1097  ;;  %v333_v16 = vmul.f32 %v1092_v2, %v332_v9  ;;  %v649_v18 = vmul.f32 0.6931472, %v1096_v11  ;;  %v430_v9 = vmul.f32 0.40528473, %v429_v48 }
  0x7c   : >> { %v495_v19 = vsub.f32 1.0, %v1098_v15  ;;  %v642_v21 = vmul.f32 %v641_v13, %v640_v4  ;;  %v647_v22 = vmul.f32 %v646_v14, %v645_v7  ;;  %v511_v7 = vsub.f32 %v510_v50, %v1634_v58 }
  0x7d   : >> { %v334_v23 = vmul.f32 0.5, %v333_v16  ;;  %v650_v24 = vmul.f32 0.5, %v649_v18 }
  0x7e   : >> { %v1637_v25 = vadd.f32 1e-07, %v495_v19  ;;  %v1100_v27 = vpop.eup %1099  ;;  %v654_v33 = vadd.f32 %v647_v22, %v642_v21  ;;  %v512_v15 = vmul.f32 %v511_v7, %v511_v7 }
  0x7f   : >> { %v335_v28 = vsub.f32 1.5, %v334_v23  ;;  %v651_v30 = vsub.f32 %v650_v24, %v1558_v10  ;;  %v415_v3 = vmul.f32 %v1100_v27, %v1624_v62  ;;  %v346_v10 = vmul.f32 %v345_v29, %v345_v29 }
  0x80   : >> { %1101 = vrsqrt.f32 %v1637_v25  ;;  %vm504_vm4 = vcmp.eq.f32.partialorder %v1637_v25, inf  ;;  %vm506_vm5 = vcmp.eq.f32.partialorder %v1637_v25, 0.0  ;;  %v513_v24 = vmul.f32 0.40528473, %v512_v15 }
  0x81   : >> { %v336_v34 = vmul.f32 %v1092_v2, %v335_v28  ;;  %1103 = vpow2.f32 %v576_v26  ;;  %v416_v36 = vmul.f32 %v1100_v27, %v415_v3  ;;  %v653_v5 = vsub.f32 %v651_v30, %v652_v31 }
  0x82   : >> { %v347_v0 = vmul.f32 0.40528473, %v346_v10 }
  0x83   : >> { %v337_v37 = vmul.f32 %v336_v34, %v1615_v47  ;;  %v417_v40 = vmul.f32 0.5, %v416_v36  ;;  %v655_v41 = vadd.f32 %v654_v33, %v653_v5 }
  0x85   : >> { %v339_v42 = vsel %vm338_vm0, %v1615_v47, %v337_v37  ;;  %v418_v38 = vsub.f32 1.5, %v417_v40  ;;  %v656_v6 = vmax.f32 %v655_v41, 1e-07  ;;  %v424_v47 = vand.u32 2147483648, %v1624_v62 }
  0x86   : >> { %v1102_v43 = vpop.eup %1101  ;;  %v1653_v44 = vsel %vm340_vm1, %v341_v35, %v339_v42 }
  0x87   : >> { %v1104_v45 = vpop.eup %1103  ;;  %v343_v46 = vsub.f32 1.0, %v1653_v44  ;;  %v498_v1 = vmul.f32 %v1102_v43, %v1637_v25  ;;  %v419_v49 = vmul.f32 %v1100_v27, %v418_v38  ;;  %v657_v53 = vmin.f32 %v656_v6, 100.0 }
  0x88   : >> { %v578_v51 = vsub.f32 1.0, %v1104_v45  ;;  %v593_v27 = vstv %s1668_s26 }
  0x89   : >> { %v348_v54 = vsub.f32 1.0, %v343_v46  ;;  %v499_v55 = vmul.f32 %v1102_v43, %v498_v1  ;;  %v420_v56 = vmul.f32 %v419_v49, %v1624_v62  ;;  %v658_v59 = vsub.f32 0.0, %v657_v53 }
  0x8a   : >> { %v1663_v57 = vadd.f32 1e-07, %v578_v51 }
  0x8b   : >> { %v349_v60 = vadd.f32 %v348_v54, %v347_v0  ;;  %v500_v52 = vmul.f32 0.5, %v499_v55  ;;  %v422_v61 = vsel %vm421_vm2, %v1624_v62, %v420_v56  ;;  %v659_v11 = vmul.f32 1.442695, %v658_v59 }
  0x8c   : >> { %1105 = vrsqrt.f32 %v1663_v57  ;;  %v425_v2 = vsel %vm423_vm3, %v424_v47, %v422_v61  ;;  %v507_v62 = vand.u32 2147483648, %v1637_v25  ;;  %vm587_vm6 = vcmp.eq.f32.partialorder %v1663_v57, inf }
  0x8d   : >> { %v350_v63 = vadd.f32 1e-07, %v349_v60  ;;  %v501_v4 = vsub.f32 1.5, %v500_v52  ;;  %v426_v8 = vsub.f32 1.0, %v425_v2  ;;  %v590_v39 = vand.u32 2147483648, %v1663_v57 }
  0x8e   : >> { %vm589_vm7 = vcmp.eq.f32.partialorder %v1663_v57, 0.0  ;;  %v676_v54 = vstv %s620_s27 }
  0x8f   : >> { %1107 = vrcp.f32 %v350_v63  ;;  %v502_v12 = vmul.f32 %v1102_v43, %v501_v4  ;;  %v431_v13 = vsub.f32 1.0, %v426_v8 }
  0x90   : >> { %1109 = vpow2.f32 %v659_v11 }
  0x91   : >> { %v503_v14 = vmul.f32 %v502_v12, %v1637_v25  ;;  %v432_v17 = vadd.f32 %v431_v13, %v430_v9 }
  0x92   : >> { %v1106_v16 = vpop.eup %1105 }
  0x93   : >> { %v505_v18 = vsel %vm504_vm4, %v1637_v25, %v503_v14  ;;  %v581_v19 = vmul.f32 %v1106_v16, %v1663_v57  ;;  %v433_v20 = vadd.f32 1e-07, %v432_v17  ;;  %v594_v25 = vsub.f32 %v593_v27, %v1634_v58 }
  0x94   : >> { %v508_v21 = vsel %vm506_vm5, %v507_v62, %v505_v18 }
  0x95   : >> { %v1108_v22 = vpop.eup %1107  ;;  %v509_v23 = vsub.f32 1.0, %v508_v21  ;;  %v582_v26 = vmul.f32 %v1106_v16, %v581_v19  ;;  %1111 = vrcp.f32 %v433_v20  ;;  %v595_v40 = vmul.f32 %v594_v25, %v594_v25 }
  0x96   : >> { %v1110_v28 = vpop.eup %1109  ;;  %v352_v29 = vmul.f32 %v1108_v22, %v347_v0 }
  0x97   : >> { %v514_v30 = vsub.f32 1.0, %v509_v23  ;;  %v583_v31 = vmul.f32 0.5, %v582_v26  ;;  %v661_v3 = vsub.f32 1.0, %v1110_v28 }
  0x98   : >> { %v353_v32 = vmul.f32 %v352_v29, %v347_v0  ;;  %v596_v0 = vmul.f32 0.40528473, %v595_v40 }
  0x99   : >> { %v515_v33 = vadd.f32 %v514_v30, %v513_v24  ;;  %v584_v34 = vsub.f32 1.5, %v583_v31  ;;  %v662_v35 = vadd.f32 1e-07, %v661_v3 }
  0x9a   : >> { %v354_v36 = vsub.f32 %v343_v46, %v353_v32 }
  0x9b   : >> { %v516_v5 = vadd.f32 1e-07, %v515_v33  ;;  %v585_v37 = vmul.f32 %v1106_v16, %v584_v34  ;;  %1113 = vrsqrt.f32 %v662_v35  ;;  %v1112_v10 = vpop.eup %1111  ;;  %vm670_vm8 = vcmp.eq.f32.partialorder %v662_v35, inf }
  0x9c   : >> { %356 = vst [vmem:[%s1680_s21] sm:$0xff] %v354_v36  ;;  %v435_v41 = vmul.f32 %v1112_v10, %v430_v9  ;;  %v673_v61 = vand.u32 2147483648, %v662_v35  ;;  %vm672_vm9 = vcmp.eq.f32.partialorder %v662_v35, 0.0 }
  0x9d   : >> { %1115 = vrcp.f32 %v516_v5  ;;  %v586_v42 = vmul.f32 %v585_v37, %v1663_v57 }
  0x9e   : >> { %v436_v43 = vmul.f32 %v435_v41, %v430_v9 }
  0x9f   : >> { %v588_v44 = vsel %vm587_vm6, %v1663_v57, %v586_v42  ;;  %v677_v57 = vsub.f32 %v676_v54, %v1634_v58 }
  0xa0   : >> { %v591_v38 = vsel %vm589_vm7, %v590_v39, %v588_v44  ;;  %v437_v45 = vsub.f32 %v426_v8, %v436_v43 }
  0xa1   : >> { %v1114_v6 = vpop.eup %1113  ;;  %v592_v46 = vsub.f32 1.0, %v591_v38  ;;  %v678_v2 = vmul.f32 %v677_v57, %v677_v57 }
  0xa2   : >> { %v664_v48 = vmul.f32 %v1114_v6, %v662_v35  ;;  %943 = vst [vmem:[%s1680_s21 + $0x10] sm:$0xff] %v437_v45  ;;  %v440_v16 = vadd.f32 %v437_v45, %v354_v36 }
  0xa3   : >> { %v1116_v1 = vpop.eup %1115  ;;  %v597_v49 = vsub.f32 1.0, %v592_v46  ;;  %v679_v12 = vmul.f32 0.40528473, %v678_v2 }
  0xa4   : >> { %v518_v50 = vmul.f32 %v1116_v1, %v513_v24  ;;  %v665_v51 = vmul.f32 %v1114_v6, %v664_v48 }
  0xa5   : >> { %v598_v53 = vadd.f32 %v597_v49, %v596_v0 }
  0xa6   : >> { %v519_v47 = vmul.f32 %v518_v50, %v513_v24  ;;  %v666_v55 = vmul.f32 0.5, %v665_v51 }
  0xa7   : >> { %v599_v56 = vadd.f32 1e-07, %v598_v53 }
  0xa8   : >> { %v520_v59 = vsub.f32 %v509_v23, %v519_v47  ;;  %v667_v60 = vsub.f32 1.5, %v666_v55 }
  0xa9   : >> { %1117 = vrcp.f32 %v599_v56 }
  0xaa   : >> { %945 = vst [vmem:[%s1680_s21 + $0x20] sm:$0xff] %v520_v59  ;;  %v668_v52 = vmul.f32 %v1114_v6, %v667_v60  ;;  %v523_v17 = vadd.f32 %v520_v59, %v440_v16 }
  0xac   : >> { %v669_v63 = vmul.f32 %v668_v52, %v662_v35 }
  0xae   : >> { %v671_v4 = vsel %vm670_vm8, %v662_v35, %v669_v63 }
  0xaf   : >> { %v1118_v7 = vpop.eup %1117  ;;  %v674_v8 = vsel %vm672_vm9, %v673_v61, %v671_v4 }
  0xb0   : >> { %v601_v9 = vmul.f32 %v1118_v7, %v596_v0  ;;  %v675_v11 = vsub.f32 1.0, %v674_v8 }
  0xb2   : >> { %v602_v13 = vmul.f32 %v601_v9, %v596_v0  ;;  %v680_v62 = vsub.f32 1.0, %v675_v11 }
  0xb4   : >> { %v603_v58 = vsub.f32 %v592_v46, %v602_v13  ;;  %v681_v14 = vadd.f32 %v680_v62, %v679_v12 }
  0xb6   : >> { %947 = vst [vmem:[%s1680_s21 + $0x30] sm:$0xff] %v603_v58  ;;  %v682_v15 = vadd.f32 1e-07, %v681_v14  ;;  %v606_v20 = vadd.f32 %v603_v58, %v523_v17 }
  0xb8   : >> { %1119 = vrcp.f32 %v682_v15 }
  0xbe   : >> { %v1120_v18 = vpop.eup %1119 }
  0xbf   : >> { %v684_v19 = vmul.f32 %v1120_v18, %v679_v12 }
  0xc1   : >> { %v685_v21 = vmul.f32 %v684_v19, %v679_v12 }
  0xc3   : >> { %v686_v22 = vsub.f32 %v675_v11, %v685_v21 }
  0xc5   : >> { %949 = vst [vmem:[%s1680_s21 + $0x40] sm:$0xff] %v686_v22  ;;  %v689_v23 = vadd.f32 %v686_v22, %v606_v20 }
  0xc7   : >> { %v690_v24 = vsub.f32 5.0, %v689_v23  ;;  %245 = sbr.rel (!%p243_p1) target bundleno = 56 (0x38), region = 115 }
  0xc9   : >> { %v691_v26 = vmul.f32 0.2, %v690_v24 }
  0xcb   : >> { %693 = vst [vmem:[%s692_s13] sm:$0xff] %v691_v26 }
  0xcc   : > { %1193 = shalt.err (!%p1190_p3)
}
  0xcd   : > { %s1297_s30 = smov 128   ;;  %s1298_s0 = smov 8  }
  0xce   : > { %987 = dma.vmem_to_hbm [thread:$0]  (%p1394_p5), %s715_s11, 256, %s717_s24, %s695_s16, %s1297_s30, %s1297_s30, %s1298_s0  }
  0xcf   : > { %s980_s9 = smul.u32 80, %s1280_s15  ;;  %s733_s1 = sshll.u32 %s1430_s4, 4  ;;  %s734_s1 = int_to_ptr.vmem [resolvable:$true] %s733_s1 }
  0xd0   : > { %s700_s13 = scalar_lea.sflag [#allocation9], %s1416_s5  ;;  %s1214_s15 = scalar_lea.hbm %s1757_s3, 160 }
  0xd1   : > { %s732_s17 = scalar_lea.hbm %s1757_s3, %s980_s9 }
  0xd2   : > { %s735_s27 = sshll.u32 %s732_s17, 4  ;;  %s736_s27 = int_to_ptr.hbm [resolvable:$true] %s735_s27 }
  0xd3   : > { %s1208_s20 = sshra.s32 %s736_s27, 4  ;;  %s1209_s20 = int_to_ptr.hbm [resolvable:$true] %s1208_s20 }
  0xd4   : > { %s1210_s29 = scalar_lea.hbm %s1209_s20, 80  ;;  %p1215_p1 = scmp.lt.s32.totalorder %s1209_s20, %s1757_s3 }
  0xd5   : > { %p1211_p7 = scmp.ne.s32.totalorder %s1209_s20, %s1210_s29  ;;  %p1216_p2 = scmp.lt.s32.totalorder %s1214_s15, %s1210_s29 }
  0xd7   : > { %p1212_p9 = pnand %p1211_p7, %p1394_p5  ;;  %p1217_p4 = por %p1216_p2, %p1215_p1 }
  0xd9   : > { %p1213_p11 = pneg %p1212_p9 }
  0xdb   : > { %p1218_p8 = pnand %p1217_p4, %p1213_p11 }
  0xdd   : > { %1221 = shalt.err (!%p1218_p8)
}
  0xde   : > { %988 = dma.vmem_to_hbm [thread:$0]  (%p1394_p5), %s734_s1, 1280, %s736_s27, %s700_s13, %s1297_s30, %s1297_s30, %s1298_s0  }
  0xdf PF: > { %s1782_s5 = sld [smem:[#allocation17_spill]]  ;;  %s750_s24 = sand.u32 1, %s1268_s12  }
  0xe0   : > { %p1000_p12 = pnand %p916_p10, %p1368_p6  ;;  %s751_s16 = scalar_lea.sflag [#allocation4], %s750_s24 }
  0xe2   : > { %p1001_p13 = pneg %p1000_p12 }
  0xe4   : > { %1259 = dma.done.wait (%p1001_p13), %s751_s16, 256  }
  0xe5   : > { %1261 = vsyncadd (%p1001_p13), %s751_s16, 4294967040  ;;  %s761_s18 = scalar_lea.sflag [#allocation9], %s750_s24 }
  0xe6   : > { %1263 = dma.done.wait (%p1001_p13), %s761_s18, 1280  }
  0xe7   : > { %1265 = vsyncadd (%p1001_p13), %s761_s18, 4294966016  ;;  %s24_s17 = sadd.s32 1, %s1782_s5   ;;  %s1783_s12 = sld [smem:[#allocation14_spill]] }
  0xe8   : > { %p21_p0 = scmp.ge.s32.totalorder %s24_s17, 4   ;;  %s1784_s13 = sld [smem:[#allocation15_spill]] }
  0xe9   : > { %s1785_s14 = sld [smem:[#allocation19_spill]] }
  0xea   : > { %s1786_s15 = sld [smem:[#allocation16_spill]]  ;;  %23 = sbr.rel (!%p21_p0) target bundleno = 12 (0xc), region = 126 }
  0xeb   : > { %s1787_s16 = sld [smem:[#allocation18_spill]] }
  0xef   :  { %767 = vsyncpa [#allocation3], 1 }
  0xf0   :  { %769 = vsyncpa [#allocation3 + $0x1], 1 }
  0xf1   :  { %770 = vsyncpa [#allocation4], 1 }
  0xf2   :  { %772 = vsyncpa [#allocation4 + $0x1], 1 }
  0xf3   :  { %773 = vsyncpa [#allocation9], 1 }
  0xf4   :  { %775 = vsyncpa [#allocation9 + $0x1], 1 }
  0xf5   :  { %776 = vsyncpa [#allocation5], 1 }
  0xf6   :  { %778 = vsyncpa [#allocation5 + $0x1], 1 }

</bundles_post_ra>
